<compile_context>
chip_gen: v6e
topology: v6e:2x2x1
jax: 0.10.0
libtpu: 0.0.40
codegen_flags: <defaults>
</compile_context>

<pallas_src>
import jax
import jax.numpy as jnp
from jax.experimental import pallas as pl
from jax.experimental.pallas import tpu as pltpu


def lstm_kernel(x_ref, wih_ref, whh_ref, b_ref, wfc_ref, bfc_ref, out_ref):
    TB, C = x_ref.shape
    B = out_ref.shape[0]
    T = TB // B
    Hp = whh_ref.shape[0]          # padded hidden size (multiple of 128)

    # Phase 1 (time-parallel, off the serial path): fused input projection + bias
    # for the whole sequence in a single MXU GEMM: (T*B, C) @ (C, 4*Hp) + b.
    xw = (jnp.dot(x_ref[...], wih_ref[...], preferred_element_type=jnp.float32)
          + b_ref[...])                                        # (T*B, 4*Hp)

    w_hh = whh_ref[...]                                        # (Hp, 4*Hp), resident

    # Phase 2: serial recurrence. T is small & static -> fully unrolled so the
    # scheduler sees the whole chain; one (B,Hp)x(Hp,4*Hp) MXU push per step.
    h = jnp.zeros((B, Hp), jnp.float32)
    c = jnp.zeros((B, Hp), jnp.float32)
    for t in range(T):
        gates = xw[t * B:(t + 1) * B, :] + jnp.dot(
            h, w_hh, preferred_element_type=jnp.float32)        # (B, 4*Hp)
        # Lane-aligned static gate slices (offsets 0 / Hp / 2Hp / 3Hp).
        i_g = jax.nn.sigmoid(gates[:, 0 * Hp:1 * Hp])
        f_g = jax.nn.sigmoid(gates[:, 1 * Hp:2 * Hp])
        g_g = jnp.tanh(gates[:, 2 * Hp:3 * Hp])
        o_g = jax.nn.sigmoid(gates[:, 3 * Hp:4 * Hp])
        c = f_g * c + i_g * g_g
        h = o_g * jnp.tanh(c)
        # Padded lanes: pre-activation 0 -> i=f=o=0.5, g=0 => c_pad, h_pad stay 0.

    # Dropout (eval mode) is identity.
    # Phase 3: fc head on the last hidden state; padded rows/cols of W_fc are zero.
    out_ref[...] = (jnp.dot(h, wfc_ref[...], preferred_element_type=jnp.float32)
                    + bfc_ref[...]).astype(out_ref.dtype)


def _round_up(n, m):
    return ((n + m - 1) // m) * m


@jax.jit
def lstm_forward(x, w_ih, w_hh, b, w_fc, b_fc):
    """x: (B, T, C); w_ih: (4, C, H); w_hh: (4, H, H); b: (4, 1, H);
    w_fc: (H, K); b_fc: (1, K). Gate order [i, f, g, o]."""
    B, T, C = x.shape
    H = w_hh.shape[-1]
    K = w_fc.shape[-1]
    Hp = max(_round_up(H, 128), 128)
    Kp = max(_round_up(K, 128), 128)

    # Stack the 4 gates along the last axis, each gate lane-padded to Hp so that
    # in-kernel gate slices land on 128-lane boundaries. Padded entries are zero.
    def stack_gates(w, n_rows):              # w: (4, rows, H) -> (n_rows, 4*Hp)
        out = jnp.zeros((n_rows, 4 * Hp), jnp.float32)
        for g in range(4):
            out = out.at[:w.shape[1], g * Hp:g * Hp + H].set(w[g])
        return out

    wih_s = stack_gates(w_ih, C)                              # (C, 4*Hp)
    whh_s = stack_gates(w_hh, Hp)                             # (Hp, 4*Hp)
    b_s = jnp.zeros((1, 4 * Hp), jnp.float32)
    for g in range(4):
        b_s = b_s.at[:, g * Hp:g * Hp + H].set(b[g])

    wfc_p = jnp.zeros((Hp, Kp), jnp.float32).at[:H, :K].set(w_fc)
    bfc_p = jnp.zeros((1, Kp), jnp.float32).at[:, :K].set(b_fc)

    # Time-major flatten of x (row index = t*B + b) so the whole-sequence input
    # projection is one well-shaped GEMM in-kernel.
    x2d = jnp.swapaxes(x, 0, 1).reshape(T * B, C).astype(jnp.float32)

    out_p = pl.pallas_call(
        lstm_kernel,
        out_shape=jax.ShapeDtypeStruct((B, Kp), jnp.float32),
        grid_spec=pltpu.PrefetchScalarGridSpec(
            num_scalar_prefetch=0,
            grid=(1,),                                        # single invocation
            in_specs=[
                pl.BlockSpec((T * B, C), lambda i: (0, 0)),   # x (time-major, resident)
                pl.BlockSpec((C, 4 * Hp), lambda i: (0, 0)),  # fused W_ih
                pl.BlockSpec((Hp, 4 * Hp), lambda i: (0, 0)), # fused W_hh
                pl.BlockSpec((1, 4 * Hp), lambda i: (0, 0)),  # fused bias
                pl.BlockSpec((Hp, Kp), lambda i: (0, 0)),     # fc weight (padded)
                pl.BlockSpec((1, Kp), lambda i: (0, 0)),      # fc bias (padded)
            ],
            out_specs=pl.BlockSpec((B, Kp), lambda i: (0, 0)),
        ),
        compiler_params=pltpu.CompilerParams(
            dimension_semantics=("arbitrary",),
        ),
    )(x2d, wih_s, whh_s, b_s, wfc_p, bfc_p)
    return out_p[:, :K]


def reference_forward(x, w_ih, w_hh, b, w_fc, b_fc):
    """Pure-JAX reference matching the PyTorch LSTM gate equations."""
    B, T, C = x.shape
    H = w_hh.shape[-1]
    h = jnp.zeros((B, H), jnp.float32)
    c = jnp.zeros((B, H), jnp.float32)

    def step(carry, x_t):
        h, c = carry

        def gate(k):
            return x_t @ w_ih[k] + h @ w_hh[k] + b[k]

        i_g = jax.nn.sigmoid(gate(0))
        f_g = jax.nn.sigmoid(gate(1))
        g_g = jnp.tanh(gate(2))
        o_g = jax.nn.sigmoid(gate(3))
        c_new = f_g * c + i_g * g_g
        h_new = o_g * jnp.tanh(c_new)
        return (h_new, c_new), None

    (h, c), _ = jax.lax.scan(step, (h, c), jnp.swapaxes(x, 0, 1))
    return h @ w_fc + b_fc


if __name__ == "__main__":
    # Shapes consistent with the module: num_channels=16 (LSTM input size),
    # hidden_size=100 (module default), num_classes=10, batch=2, seq=8.
    B, T, C, H, K = 2, 8, 16, 100, 10

    key = jax.random.PRNGKey(0)
    k = jax.random.split(key, 7)
    bound = 1.0 / jnp.sqrt(jnp.float32(H))  # PyTorch default init range

    x = jax.random.normal(k[0], (B, T, C), jnp.float32)

    # Gate order [i, f, g, o]; weights stored pre-transposed for x @ W.
    w_ih = jax.random.uniform(k[1], (4, C, H), jnp.float32, -bound, bound)
    w_hh = jax.random.uniform(k[2], (4, H, H), jnp.float32, -bound, bound)
    # PyTorch has b_ih + b_hh; fold into a single bias per gate.
    b_ih = jax.random.uniform(k[3], (4, 1, H), jnp.float32, -bound, bound)
    b_hh = jax.random.uniform(k[4], (4, 1, H), jnp.float32, -bound, bound)
    b = b_ih + b_hh

    fc_bound = 1.0 / jnp.sqrt(jnp.float32(H))
    w_fc = jax.random.uniform(k[5], (H, K), jnp.float32, -fc_bound, fc_bound)
    b_fc = jax.random.uniform(k[6], (1, K), jnp.float32, -fc_bound, fc_bound)

    out = jax.block_until_ready(lstm_forward(x, w_ih, w_hh, b, w_fc, b_fc))
    ref = jax.block_until_ready(reference_forward(x, w_ih, w_hh, b, w_fc, b_fc))

    assert out.shape == (B, K)
    assert jnp.allclose(out, ref, atol=1e-3, rtol=1e-3), "mismatch vs reference"

    print("KERNEL_OK")
</pallas_src>

<mosaic_0001>
module attributes {stable_mosaic.version = 11 : i64} {
  func.func @lstm_kernel(%arg0: i32, %arg1: memref<16x16xf32, #tpu.memory_space<vmem>>, %arg2: memref<16x512xf32, #tpu.memory_space<vmem>>, %arg3: memref<128x512xf32, #tpu.memory_space<vmem>>, %arg4: memref<1x512xf32, #tpu.memory_space<vmem>>, %arg5: memref<128x128xf32, #tpu.memory_space<vmem>>, %arg6: memref<1x128xf32, #tpu.memory_space<vmem>>, %arg7: memref<2x128xf32, #tpu.memory_space<vmem>>) attributes {dimension_semantics = [#tpu.dimension_semantics<arbitrary>], iteration_bounds = array<i64: 1>, scalar_prefetch = 0 : i64, scratch_operands = 0 : i64, tpu.core_type = #tpu.core_type<tc>, window_params = [{pipeline_mode = #tpu.pipeline_mode<synchronous>, transform_indices = @transform_0, window_bounds = array<i64: 16, 16>}, {pipeline_mode = #tpu.pipeline_mode<synchronous>, transform_indices = @transform_1, window_bounds = array<i64: 16, 512>}, {pipeline_mode = #tpu.pipeline_mode<synchronous>, transform_indices = @transform_2, window_bounds = array<i64: 128, 512>}, {pipeline_mode = #tpu.pipeline_mode<synchronous>, transform_indices = @transform_3, window_bounds = array<i64: 1, 512>}, {pipeline_mode = #tpu.pipeline_mode<synchronous>, transform_indices = @transform_4, window_bounds = array<i64: 128, 128>}, {pipeline_mode = #tpu.pipeline_mode<synchronous>, transform_indices = @transform_5, window_bounds = array<i64: 1, 128>}, {pipeline_mode = #tpu.pipeline_mode<synchronous>, transform_indices = @transform_6, window_bounds = array<i64: 2, 128>}]} {
    %c0 = arith.constant 0 : index
    %c0_0 = arith.constant 0 : index
    %0 = vector.load %arg1[%c0, %c0_0] : memref<16x16xf32, #tpu.memory_space<vmem>>, vector<16x16xf32>
    %c0_1 = arith.constant 0 : index
    %c0_2 = arith.constant 0 : index
    %1 = vector.load %arg2[%c0_1, %c0_2] : memref<16x512xf32, #tpu.memory_space<vmem>>, vector<16x512xf32>
    %cst = arith.constant dense<0.000000e+00> : vector<16x512xf32>
    %2 = tpu.matmul %0, %1, %cst {dimension_numbers = #tpu.dot_dimension_numbers<[1], [0], [0], [1], [0, 0, 1, 1], [], []>} : vector<16x16xf32>, vector<16x512xf32>, vector<16x512xf32> -> vector<16x512xf32>
    %c0_3 = arith.constant 0 : index
    %c0_4 = arith.constant 0 : index
    %3 = vector.load %arg4[%c0_3, %c0_4] : memref<1x512xf32, #tpu.memory_space<vmem>>, vector<1x512xf32>
    %4 = vector.broadcast %3 : vector<1x512xf32> to vector<16x512xf32>
    %5 = arith.addf %2, %4 : vector<16x512xf32>
    %c0_5 = arith.constant 0 : index
    %c0_6 = arith.constant 0 : index
    %6 = vector.load %arg3[%c0_5, %c0_6] : memref<128x512xf32, #tpu.memory_space<vmem>>, vector<128x512xf32>
    %cst_7 = arith.constant 0.000000e+00 : f32
    %7 = vector.broadcast %cst_7 : f32 to vector<2x128xf32>
    %cst_8 = arith.constant 0.000000e+00 : f32
    %8 = vector.broadcast %cst_8 : f32 to vector<2x128xf32>
    %9 = vector.extract_strided_slice %5 {offsets = [0, 0], sizes = [2, 512], strides = [1, 1]} : vector<16x512xf32> to vector<2x512xf32>
    %cst_9 = arith.constant dense<0.000000e+00> : vector<2x512xf32>
    %10 = tpu.matmul %7, %6, %cst_9 {dimension_numbers = #tpu.dot_dimension_numbers<[1], [0], [0], [1], [0, 0, 1, 1], [], []>} : vector<2x128xf32>, vector<128x512xf32>, vector<2x512xf32> -> vector<2x512xf32>
    %11 = arith.addf %9, %10 : vector<2x512xf32>
    %12 = vector.extract_strided_slice %11 {offsets = [0, 0], sizes = [2, 128], strides = [1, 1]} : vector<2x512xf32> to vector<2x128xf32>
    %13 = arith.negf %12 : vector<2x128xf32>
    %14 = math.exp %13 : vector<2x128xf32>
    %cst_10 = arith.constant 1.000000e+00 : f32
    %15 = vector.broadcast %cst_10 : f32 to vector<2x128xf32>
    %16 = arith.addf %15, %14 : vector<2x128xf32>
    %17 = arith.divf %15, %16 : vector<2x128xf32>
    %18 = vector.extract_strided_slice %11 {offsets = [0, 128], sizes = [2, 128], strides = [1, 1]} : vector<2x512xf32> to vector<2x128xf32>
    %19 = arith.negf %18 : vector<2x128xf32>
    %20 = math.exp %19 : vector<2x128xf32>
    %cst_11 = arith.constant 1.000000e+00 : f32
    %21 = vector.broadcast %cst_11 : f32 to vector<2x128xf32>
    %22 = arith.addf %21, %20 : vector<2x128xf32>
    %23 = arith.divf %21, %22 : vector<2x128xf32>
    %24 = vector.extract_strided_slice %11 {offsets = [0, 256], sizes = [2, 128], strides = [1, 1]} : vector<2x512xf32> to vector<2x128xf32>
    %25 = math.tanh %24 : vector<2x128xf32>
    %26 = vector.extract_strided_slice %11 {offsets = [0, 384], sizes = [2, 128], strides = [1, 1]} : vector<2x512xf32> to vector<2x128xf32>
    %27 = arith.negf %26 : vector<2x128xf32>
    %28 = math.exp %27 : vector<2x128xf32>
    %cst_12 = arith.constant 1.000000e+00 : f32
    %29 = vector.broadcast %cst_12 : f32 to vector<2x128xf32>
    %30 = arith.addf %29, %28 : vector<2x128xf32>
    %31 = arith.divf %29, %30 : vector<2x128xf32>
    %32 = arith.mulf %23, %8 : vector<2x128xf32>
    %33 = arith.mulf %17, %25 : vector<2x128xf32>
    %34 = arith.addf %32, %33 : vector<2x128xf32>
    %35 = math.tanh %34 : vector<2x128xf32>
    %36 = arith.mulf %31, %35 : vector<2x128xf32>
    %37 = vector.extract_strided_slice %5 {offsets = [2, 0], sizes = [2, 512], strides = [1, 1]} : vector<16x512xf32> to vector<2x512xf32>
    %cst_13 = arith.constant dense<0.000000e+00> : vector<2x512xf32>
    %38 = tpu.matmul %36, %6, %cst_13 {dimension_numbers = #tpu.dot_dimension_numbers<[1], [0], [0], [1], [0, 0, 1, 1], [], []>} : vector<2x128xf32>, vector<128x512xf32>, vector<2x512xf32> -> vector<2x512xf32>
    %39 = arith.addf %37, %38 : vector<2x512xf32>
    %40 = vector.extract_strided_slice %39 {offsets = [0, 0], sizes = [2, 128], strides = [1, 1]} : vector<2x512xf32> to vector<2x128xf32>
    %41 = arith.negf %40 : vector<2x128xf32>
    %42 = math.exp %41 : vector<2x128xf32>
    %cst_14 = arith.constant 1.000000e+00 : f32
    %43 = vector.broadcast %cst_14 : f32 to vector<2x128xf32>
    %44 = arith.addf %43, %42 : vector<2x128xf32>
    %45 = arith.divf %43, %44 : vector<2x128xf32>
    %46 = vector.extract_strided_slice %39 {offsets = [0, 128], sizes = [2, 128], strides = [1, 1]} : vector<2x512xf32> to vector<2x128xf32>
    %47 = arith.negf %46 : vector<2x128xf32>
    %48 = math.exp %47 : vector<2x128xf32>
    %cst_15 = arith.constant 1.000000e+00 : f32
    %49 = vector.broadcast %cst_15 : f32 to vector<2x128xf32>
    %50 = arith.addf %49, %48 : vector<2x128xf32>
    %51 = arith.divf %49, %50 : vector<2x128xf32>
    %52 = vector.extract_strided_slice %39 {offsets = [0, 256], sizes = [2, 128], strides = [1, 1]} : vector<2x512xf32> to vector<2x128xf32>
    %53 = math.tanh %52 : vector<2x128xf32>
    %54 = vector.extract_strided_slice %39 {offsets = [0, 384], sizes = [2, 128], strides = [1, 1]} : vector<2x512xf32> to vector<2x128xf32>
    %55 = arith.negf %54 : vector<2x128xf32>
    %56 = math.exp %55 : vector<2x128xf32>
    %cst_16 = arith.constant 1.000000e+00 : f32
    %57 = vector.broadcast %cst_16 : f32 to vector<2x128xf32>
    %58 = arith.addf %57, %56 : vector<2x128xf32>
    %59 = arith.divf %57, %58 : vector<2x128xf32>
    %60 = arith.mulf %51, %34 : vector<2x128xf32>
    %61 = arith.mulf %45, %53 : vector<2x128xf32>
    %62 = arith.addf %60, %61 : vector<2x128xf32>
    %63 = math.tanh %62 : vector<2x128xf32>
    %64 = arith.mulf %59, %63 : vector<2x128xf32>
    %65 = vector.extract_strided_slice %5 {offsets = [4, 0], sizes = [2, 512], strides = [1, 1]} : vector<16x512xf32> to vector<2x512xf32>
    %cst_17 = arith.constant dense<0.000000e+00> : vector<2x512xf32>
    %66 = tpu.matmul %64, %6, %cst_17 {dimension_numbers = #tpu.dot_dimension_numbers<[1], [0], [0], [1], [0, 0, 1, 1], [], []>} : vector<2x128xf32>, vector<128x512xf32>, vector<2x512xf32> -> vector<2x512xf32>
    %67 = arith.addf %65, %66 : vector<2x512xf32>
    %68 = vector.extract_strided_slice %67 {offsets = [0, 0], sizes = [2, 128], strides = [1, 1]} : vector<2x512xf32> to vector<2x128xf32>
    %69 = arith.negf %68 : vector<2x128xf32>
    %70 = math.exp %69 : vector<2x128xf32>
    %cst_18 = arith.constant 1.000000e+00 : f32
    %71 = vector.broadcast %cst_18 : f32 to vector<2x128xf32>
    %72 = arith.addf %71, %70 : vector<2x128xf32>
    %73 = arith.divf %71, %72 : vector<2x128xf32>
    %74 = vector.extract_strided_slice %67 {offsets = [0, 128], sizes = [2, 128], strides = [1, 1]} : vector<2x512xf32> to vector<2x128xf32>
    %75 = arith.negf %74 : vector<2x128xf32>
    %76 = math.exp %75 : vector<2x128xf32>
    %cst_19 = arith.constant 1.000000e+00 : f32
    %77 = vector.broadcast %cst_19 : f32 to vector<2x128xf32>
    %78 = arith.addf %77, %76 : vector<2x128xf32>
    %79 = arith.divf %77, %78 : vector<2x128xf32>
    %80 = vector.extract_strided_slice %67 {offsets = [0, 256], sizes = [2, 128], strides = [1, 1]} : vector<2x512xf32> to vector<2x128xf32>
    %81 = math.tanh %80 : vector<2x128xf32>
    %82 = vector.extract_strided_slice %67 {offsets = [0, 384], sizes = [2, 128], strides = [1, 1]} : vector<2x512xf32> to vector<2x128xf32>
    %83 = arith.negf %82 : vector<2x128xf32>
    %84 = math.exp %83 : vector<2x128xf32>
    %cst_20 = arith.constant 1.000000e+00 : f32
    %85 = vector.broadcast %cst_20 : f32 to vector<2x128xf32>
    %86 = arith.addf %85, %84 : vector<2x128xf32>
    %87 = arith.divf %85, %86 : vector<2x128xf32>
    %88 = arith.mulf %79, %62 : vector<2x128xf32>
    %89 = arith.mulf %73, %81 : vector<2x128xf32>
    %90 = arith.addf %88, %89 : vector<2x128xf32>
    %91 = math.tanh %90 : vector<2x128xf32>
    %92 = arith.mulf %87, %91 : vector<2x128xf32>
    %93 = vector.extract_strided_slice %5 {offsets = [6, 0], sizes = [2, 512], strides = [1, 1]} : vector<16x512xf32> to vector<2x512xf32>
    %cst_21 = arith.constant dense<0.000000e+00> : vector<2x512xf32>
    %94 = tpu.matmul %92, %6, %cst_21 {dimension_numbers = #tpu.dot_dimension_numbers<[1], [0], [0], [1], [0, 0, 1, 1], [], []>} : vector<2x128xf32>, vector<128x512xf32>, vector<2x512xf32> -> vector<2x512xf32>
    %95 = arith.addf %93, %94 : vector<2x512xf32>
    %96 = vector.extract_strided_slice %95 {offsets = [0, 0], sizes = [2, 128], strides = [1, 1]} : vector<2x512xf32> to vector<2x128xf32>
    %97 = arith.negf %96 : vector<2x128xf32>
    %98 = math.exp %97 : vector<2x128xf32>
    %cst_22 = arith.constant 1.000000e+00 : f32
    %99 = vector.broadcast %cst_22 : f32 to vector<2x128xf32>
    %100 = arith.addf %99, %98 : vector<2x128xf32>
    %101 = arith.divf %99, %100 : vector<2x128xf32>
    %102 = vector.extract_strided_slice %95 {offsets = [0, 128], sizes = [2, 128], strides = [1, 1]} : vector<2x512xf32> to vector<2x128xf32>
    %103 = arith.negf %102 : vector<2x128xf32>
    %104 = math.exp %103 : vector<2x128xf32>
    %cst_23 = arith.constant 1.000000e+00 : f32
    %105 = vector.broadcast %cst_23 : f32 to vector<2x128xf32>
    %106 = arith.addf %105, %104 : vector<2x128xf32>
    %107 = arith.divf %105, %106 : vector<2x128xf32>
    %108 = vector.extract_strided_slice %95 {offsets = [0, 256], sizes = [2, 128], strides = [1, 1]} : vector<2x512xf32> to vector<2x128xf32>
    %109 = math.tanh %108 : vector<2x128xf32>
    %110 = vector.extract_strided_slice %95 {offsets = [0, 384], sizes = [2, 128], strides = [1, 1]} : vector<2x512xf32> to vector<2x128xf32>
    %111 = arith.negf %110 : vector<2x128xf32>
    %112 = math.exp %111 : vector<2x128xf32>
    %cst_24 = arith.constant 1.000000e+00 : f32
    %113 = vector.broadcast %cst_24 : f32 to vector<2x128xf32>
    %114 = arith.addf %113, %112 : vector<2x128xf32>
    %115 = arith.divf %113, %114 : vector<2x128xf32>
    %116 = arith.mulf %107, %90 : vector<2x128xf32>
    %117 = arith.mulf %101, %109 : vector<2x128xf32>
    %118 = arith.addf %116, %117 : vector<2x128xf32>
    %119 = math.tanh %118 : vector<2x128xf32>
    %120 = arith.mulf %115, %119 : vector<2x128xf32>
    %121 = vector.extract_strided_slice %5 {offsets = [8, 0], sizes = [2, 512], strides = [1, 1]} : vector<16x512xf32> to vector<2x512xf32>
    %cst_25 = arith.constant dense<0.000000e+00> : vector<2x512xf32>
    %122 = tpu.matmul %120, %6, %cst_25 {dimension_numbers = #tpu.dot_dimension_numbers<[1], [0], [0], [1], [0, 0, 1, 1], [], []>} : vector<2x128xf32>, vector<128x512xf32>, vector<2x512xf32> -> vector<2x512xf32>
    %123 = arith.addf %121, %122 : vector<2x512xf32>
    %124 = vector.extract_strided_slice %123 {offsets = [0, 0], sizes = [2, 128], strides = [1, 1]} : vector<2x512xf32> to vector<2x128xf32>
    %125 = arith.negf %124 : vector<2x128xf32>
    %126 = math.exp %125 : vector<2x128xf32>
    %cst_26 = arith.constant 1.000000e+00 : f32
    %127 = vector.broadcast %cst_26 : f32 to vector<2x128xf32>
    %128 = arith.addf %127, %126 : vector<2x128xf32>
    %129 = arith.divf %127, %128 : vector<2x128xf32>
    %130 = vector.extract_strided_slice %123 {offsets = [0, 128], sizes = [2, 128], strides = [1, 1]} : vector<2x512xf32> to vector<2x128xf32>
    %131 = arith.negf %130 : vector<2x128xf32>
    %132 = math.exp %131 : vector<2x128xf32>
    %cst_27 = arith.constant 1.000000e+00 : f32
    %133 = vector.broadcast %cst_27 : f32 to vector<2x128xf32>
    %134 = arith.addf %133, %132 : vector<2x128xf32>
    %135 = arith.divf %133, %134 : vector<2x128xf32>
    %136 = vector.extract_strided_slice %123 {offsets = [0, 256], sizes = [2, 128], strides = [1, 1]} : vector<2x512xf32> to vector<2x128xf32>
    %137 = math.tanh %136 : vector<2x128xf32>
    %138 = vector.extract_strided_slice %123 {offsets = [0, 384], sizes = [2, 128], strides = [1, 1]} : vector<2x512xf32> to vector<2x128xf32>
    %139 = arith.negf %138 : vector<2x128xf32>
    %140 = math.exp %139 : vector<2x128xf32>
    %cst_28 = arith.constant 1.000000e+00 : f32
    %141 = vector.broadcast %cst_28 : f32 to vector<2x128xf32>
    %142 = arith.addf %141, %140 : vector<2x128xf32>
    %143 = arith.divf %141, %142 : vector<2x128xf32>
    %144 = arith.mulf %135, %118 : vector<2x128xf32>
    %145 = arith.mulf %129, %137 : vector<2x128xf32>
    %146 = arith.addf %144, %145 : vector<2x128xf32>
    %147 = math.tanh %146 : vector<2x128xf32>
    %148 = arith.mulf %143, %147 : vector<2x128xf32>
    %149 = vector.extract_strided_slice %5 {offsets = [10, 0], sizes = [2, 512], strides = [1, 1]} : vector<16x512xf32> to vector<2x512xf32>
    %cst_29 = arith.constant dense<0.000000e+00> : vector<2x512xf32>
    %150 = tpu.matmul %148, %6, %cst_29 {dimension_numbers = #tpu.dot_dimension_numbers<[1], [0], [0], [1], [0, 0, 1, 1], [], []>} : vector<2x128xf32>, vector<128x512xf32>, vector<2x512xf32> -> vector<2x512xf32>
    %151 = arith.addf %149, %150 : vector<2x512xf32>
    %152 = vector.extract_strided_slice %151 {offsets = [0, 0], sizes = [2, 128], strides = [1, 1]} : vector<2x512xf32> to vector<2x128xf32>
    %153 = arith.negf %152 : vector<2x128xf32>
    %154 = math.exp %153 : vector<2x128xf32>
    %cst_30 = arith.constant 1.000000e+00 : f32
    %155 = vector.broadcast %cst_30 : f32 to vector<2x128xf32>
    %156 = arith.addf %155, %154 : vector<2x128xf32>
    %157 = arith.divf %155, %156 : vector<2x128xf32>
    %158 = vector.extract_strided_slice %151 {offsets = [0, 128], sizes = [2, 128], strides = [1, 1]} : vector<2x512xf32> to vector<2x128xf32>
    %159 = arith.negf %158 : vector<2x128xf32>
    %160 = math.exp %159 : vector<2x128xf32>
    %cst_31 = arith.constant 1.000000e+00 : f32
    %161 = vector.broadcast %cst_31 : f32 to vector<2x128xf32>
    %162 = arith.addf %161, %160 : vector<2x128xf32>
    %163 = arith.divf %161, %162 : vector<2x128xf32>
    %164 = vector.extract_strided_slice %151 {offsets = [0, 256], sizes = [2, 128], strides = [1, 1]} : vector<2x512xf32> to vector<2x128xf32>
    %165 = math.tanh %164 : vector<2x128xf32>
    %166 = vector.extract_strided_slice %151 {offsets = [0, 384], sizes = [2, 128], strides = [1, 1]} : vector<2x512xf32> to vector<2x128xf32>
    %167 = arith.negf %166 : vector<2x128xf32>
    %168 = math.exp %167 : vector<2x128xf32>
    %cst_32 = arith.constant 1.000000e+00 : f32
    %169 = vector.broadcast %cst_32 : f32 to vector<2x128xf32>
    %170 = arith.addf %169, %168 : vector<2x128xf32>
    %171 = arith.divf %169, %170 : vector<2x128xf32>
    %172 = arith.mulf %163, %146 : vector<2x128xf32>
    %173 = arith.mulf %157, %165 : vector<2x128xf32>
    %174 = arith.addf %172, %173 : vector<2x128xf32>
    %175 = math.tanh %174 : vector<2x128xf32>
    %176 = arith.mulf %171, %175 : vector<2x128xf32>
    %177 = vector.extract_strided_slice %5 {offsets = [12, 0], sizes = [2, 512], strides = [1, 1]} : vector<16x512xf32> to vector<2x512xf32>
    %cst_33 = arith.constant dense<0.000000e+00> : vector<2x512xf32>
    %178 = tpu.matmul %176, %6, %cst_33 {dimension_numbers = #tpu.dot_dimension_numbers<[1], [0], [0], [1], [0, 0, 1, 1], [], []>} : vector<2x128xf32>, vector<128x512xf32>, vector<2x512xf32> -> vector<2x512xf32>
    %179 = arith.addf %177, %178 : vector<2x512xf32>
    %180 = vector.extract_strided_slice %179 {offsets = [0, 0], sizes = [2, 128], strides = [1, 1]} : vector<2x512xf32> to vector<2x128xf32>
    %181 = arith.negf %180 : vector<2x128xf32>
    %182 = math.exp %181 : vector<2x128xf32>
    %cst_34 = arith.constant 1.000000e+00 : f32
    %183 = vector.broadcast %cst_34 : f32 to vector<2x128xf32>
    %184 = arith.addf %183, %182 : vector<2x128xf32>
    %185 = arith.divf %183, %184 : vector<2x128xf32>
    %186 = vector.extract_strided_slice %179 {offsets = [0, 128], sizes = [2, 128], strides = [1, 1]} : vector<2x512xf32> to vector<2x128xf32>
    %187 = arith.negf %186 : vector<2x128xf32>
    %188 = math.exp %187 : vector<2x128xf32>
    %cst_35 = arith.constant 1.000000e+00 : f32
    %189 = vector.broadcast %cst_35 : f32 to vector<2x128xf32>
    %190 = arith.addf %189, %188 : vector<2x128xf32>
    %191 = arith.divf %189, %190 : vector<2x128xf32>
    %192 = vector.extract_strided_slice %179 {offsets = [0, 256], sizes = [2, 128], strides = [1, 1]} : vector<2x512xf32> to vector<2x128xf32>
    %193 = math.tanh %192 : vector<2x128xf32>
    %194 = vector.extract_strided_slice %179 {offsets = [0, 384], sizes = [2, 128], strides = [1, 1]} : vector<2x512xf32> to vector<2x128xf32>
    %195 = arith.negf %194 : vector<2x128xf32>
    %196 = math.exp %195 : vector<2x128xf32>
    %cst_36 = arith.constant 1.000000e+00 : f32
    %197 = vector.broadcast %cst_36 : f32 to vector<2x128xf32>
    %198 = arith.addf %197, %196 : vector<2x128xf32>
    %199 = arith.divf %197, %198 : vector<2x128xf32>
    %200 = arith.mulf %191, %174 : vector<2x128xf32>
    %201 = arith.mulf %185, %193 : vector<2x128xf32>
    %202 = arith.addf %200, %201 : vector<2x128xf32>
    %203 = math.tanh %202 : vector<2x128xf32>
    %204 = arith.mulf %199, %203 : vector<2x128xf32>
    %205 = vector.extract_strided_slice %5 {offsets = [14, 0], sizes = [2, 512], strides = [1, 1]} : vector<16x512xf32> to vector<2x512xf32>
    %cst_37 = arith.constant dense<0.000000e+00> : vector<2x512xf32>
    %206 = tpu.matmul %204, %6, %cst_37 {dimension_numbers = #tpu.dot_dimension_numbers<[1], [0], [0], [1], [0, 0, 1, 1], [], []>} : vector<2x128xf32>, vector<128x512xf32>, vector<2x512xf32> -> vector<2x512xf32>
    %207 = arith.addf %205, %206 : vector<2x512xf32>
    %208 = vector.extract_strided_slice %207 {offsets = [0, 0], sizes = [2, 128], strides = [1, 1]} : vector<2x512xf32> to vector<2x128xf32>
    %209 = arith.negf %208 : vector<2x128xf32>
    %210 = math.exp %209 : vector<2x128xf32>
    %cst_38 = arith.constant 1.000000e+00 : f32
    %211 = vector.broadcast %cst_38 : f32 to vector<2x128xf32>
    %212 = arith.addf %211, %210 : vector<2x128xf32>
    %213 = arith.divf %211, %212 : vector<2x128xf32>
    %214 = vector.extract_strided_slice %207 {offsets = [0, 128], sizes = [2, 128], strides = [1, 1]} : vector<2x512xf32> to vector<2x128xf32>
    %215 = arith.negf %214 : vector<2x128xf32>
    %216 = math.exp %215 : vector<2x128xf32>
    %cst_39 = arith.constant 1.000000e+00 : f32
    %217 = vector.broadcast %cst_39 : f32 to vector<2x128xf32>
    %218 = arith.addf %217, %216 : vector<2x128xf32>
    %219 = arith.divf %217, %218 : vector<2x128xf32>
    %220 = vector.extract_strided_slice %207 {offsets = [0, 256], sizes = [2, 128], strides = [1, 1]} : vector<2x512xf32> to vector<2x128xf32>
    %221 = math.tanh %220 : vector<2x128xf32>
    %222 = vector.extract_strided_slice %207 {offsets = [0, 384], sizes = [2, 128], strides = [1, 1]} : vector<2x512xf32> to vector<2x128xf32>
    %223 = arith.negf %222 : vector<2x128xf32>
    %224 = math.exp %223 : vector<2x128xf32>
    %cst_40 = arith.constant 1.000000e+00 : f32
    %225 = vector.broadcast %cst_40 : f32 to vector<2x128xf32>
    %226 = arith.addf %225, %224 : vector<2x128xf32>
    %227 = arith.divf %225, %226 : vector<2x128xf32>
    %228 = arith.mulf %219, %202 : vector<2x128xf32>
    %229 = arith.mulf %213, %221 : vector<2x128xf32>
    %230 = arith.addf %228, %229 : vector<2x128xf32>
    %231 = math.tanh %230 : vector<2x128xf32>
    %232 = arith.mulf %227, %231 : vector<2x128xf32>
    %c0_41 = arith.constant 0 : index
    %c0_42 = arith.constant 0 : index
    %233 = vector.load %arg5[%c0_41, %c0_42] : memref<128x128xf32, #tpu.memory_space<vmem>>, vector<128x128xf32>
    %cst_43 = arith.constant dense<0.000000e+00> : vector<2x128xf32>
    %234 = tpu.matmul %232, %233, %cst_43 {dimension_numbers = #tpu.dot_dimension_numbers<[1], [0], [0], [1], [0, 0, 1, 1], [], []>} : vector<2x128xf32>, vector<128x128xf32>, vector<2x128xf32> -> vector<2x128xf32>
    %c0_44 = arith.constant 0 : index
    %c0_45 = arith.constant 0 : index
    %235 = vector.load %arg6[%c0_44, %c0_45] : memref<1x128xf32, #tpu.memory_space<vmem>>, vector<1x128xf32>
    %236 = vector.broadcast %235 : vector<1x128xf32> to vector<2x128xf32>
    %237 = arith.addf %234, %236 : vector<2x128xf32>
    %c0_46 = arith.constant 0 : index
    %c0_47 = arith.constant 0 : index
    %238 = vector.load %arg7[%c0_46, %c0_47] : memref<2x128xf32, #tpu.memory_space<vmem>>, vector<2x128xf32>
    tpu.vector_store %arg7[%c0_46, %c0_47], %237 {strides = array<i32>} : memref<2x128xf32, #tpu.memory_space<vmem>>, vector<2x128xf32>,
    return
  }
  func.func @transform_0(%arg0: i32) -> (i32, i32) {
    %c0_i32 = arith.constant 0 : i32
    %c0_i32_0 = arith.constant 0 : i32
    %c0_i32_1 = arith.constant 0 : i32
    return %c0_i32, %c0_i32_0 : i32, i32
  }
  func.func @transform_1(%arg0: i32) -> (i32, i32) {
    %c0_i32 = arith.constant 0 : i32
    %c0_i32_0 = arith.constant 0 : i32
    %c0_i32_1 = arith.constant 0 : i32
    return %c0_i32, %c0_i32_0 : i32, i32
  }
  func.func @transform_2(%arg0: i32) -> (i32, i32) {
    %c0_i32 = arith.constant 0 : i32
    %c0_i32_0 = arith.constant 0 : i32
    %c0_i32_1 = arith.constant 0 : i32
    return %c0_i32, %c0_i32_0 : i32, i32
  }
  func.func @transform_3(%arg0: i32) -> (i32, i32) {
    %c0_i32 = arith.constant 0 : i32
    %c0_i32_0 = arith.constant 0 : i32
    %c0_i32_1 = arith.constant 0 : i32
    return %c0_i32, %c0_i32_0 : i32, i32
  }
  func.func @transform_4(%arg0: i32) -> (i32, i32) {
    %c0_i32 = arith.constant 0 : i32
    %c0_i32_0 = arith.constant 0 : i32
    %c0_i32_1 = arith.constant 0 : i32
    return %c0_i32, %c0_i32_0 : i32, i32
  }
  func.func @transform_5(%arg0: i32) -> (i32, i32) {
    %c0_i32 = arith.constant 0 : i32
    %c0_i32_0 = arith.constant 0 : i32
    %c0_i32_1 = arith.constant 0 : i32
    return %c0_i32, %c0_i32_0 : i32, i32
  }
  func.func @transform_6(%arg0: i32) -> (i32, i32) {
    %c0_i32 = arith.constant 0 : i32
    %c0_i32_0 = arith.constant 0 : i32
    %c0_i32_1 = arith.constant 0 : i32
    return %c0_i32, %c0_i32_0 : i32, i32
  }
}

</mosaic_0001>

<bundles_post_ra>
// kernel: lstm_forward.1
= control target key start
LH: loop header
LB: loop body
LE: loop exit
PB: predicated region body
PF: predicated region fallthrough
CT: control target
= control target key end

     0   :  { %vm56_vm0 = vcmask 130048   ;;  %v3565_v10 = vmov 0.0   ;;  %s3558_s0 = inlined_call_operand.vmem [shape: f32[16,16], index: 0, kind: input, shape index: {}]   ;;  %s3559_s1 = inlined_call_operand.vmem [shape: f32[16,512], index: 1, kind: input, shape index: {}]   ;;  %s3560_s2 = inlined_call_operand.vmem [shape: f32[128,512], index: 2, kind: input, shape index: {}]   ;;  %s3561_s3 = inlined_call_operand.vmem [shape: f32[1,512], index: 3, kind: input, shape index: {}]   ;;  %s3562_s4 = inlined_call_operand.vmem [shape: f32[128,128], index: 4, kind: input, shape index: {}]   ;;  %s3563_s5 = inlined_call_operand.vmem [shape: f32[1,128], index: 5, kind: input, shape index: {}]   ;;  %s3564_s6 = inlined_call_operand.hbm [shape: f32[2,128], index: 6, kind: output, shape index: {}]  }
   0x1   :  { %v31_v0 = vld [vmem:[%s3559_s1 + $0x28] sm:$0xff]  ;;  %v30_v2 = vld [vmem:[%s3559_s1 + $0x20] sm:$0xff]  ;;  %127 = vmatprep.mubr.f32.mxu1 %v3565_v10  ;;  %v33_v12 = vld [vmem:[%s3559_s1 + $0x38] sm:$0xff] }
   0x2   :  { %v2202_v1 = vld [vmem:[%s3560_s2 + $0x1e8] sm:$0xff]  ;;  %91 = vmatprep.subr.mxu1 %v31_v0  ;;  %v2211_v3 = vld [vmem:[%s3560_s2 + $0x1e0] sm:$0xff]  ;;  %v32_v14 = vld [vmem:[%s3559_s1 + $0x30] sm:$0xff] }
   0x3   :  { %3661 = vst [vmem:[#allocation5_spill] sm:$0xff] %v2202_v1  ;;  %281 = vmatprep.subr.mxu0 %v2202_v1  ;;  %v27_v4 = vld [vmem:[%s3559_s1 + $0x8] sm:$0xff]  ;;  %92 = vmatpush1.msra.mxu1 %v30_v2  ;;  %v26_v6 = vld [vmem:[%s3559_s1] sm:$0xff]  ;;  %v29_v18 = vld [vmem:[%s3559_s1 + $0x18] sm:$0xff] }
   0x4   :  { %v2219_v5 = vld [vmem:[%s3560_s2 + $0x1c8] sm:$0xff]  ;;  %282 = vmatpush1.msra.mxu0 %v2211_v3  ;;  %v2228_v7 = vld [vmem:[%s3560_s2 + $0x1c0] sm:$0xff]  ;;  %93 = vmatprep.subr.mxu1 %v27_v4  ;;  %v28_v20 = vld [vmem:[%s3559_s1 + $0x10] sm:$0xff] }
   0x5   :  { %3662 = vst [vmem:[#allocation6_spill] sm:$0xff] %v2219_v5  ;;  %v24_v8 = vld [vmem:[%s3558_s0] sm:$0xff]  ;;  %283 = vmatprep.subr.mxu0 %v2219_v5  ;;  %v2237_v9 = vld [vmem:[%s3560_s2 + $0x1a8] sm:$0xff]  ;;  %94 = vmatpush1.msra.mxu1 %v26_v6  ;;  %v2305_v23 = vld [vmem:[%s3560_s2 + $0x1f8] sm:$0xff] }
   0x6   :  { %v2243_v11 = vld [vmem:[%s3560_s2 + $0x1a0] sm:$0xff]  ;;  %284 = vmatpush1.msra.mxu0 %v2228_v7  ;;  %1860 = vmatmul.mubr.msk.f32.vlgmr.msra.gmra.mxu1 %vm56_vm0, %v24_v8  ;;  %v2253_v13 = vld [vmem:[%s3560_s2 + $0x188] sm:$0xff]  ;;  %3663 = vst [vmem:[#allocation7_spill] sm:$0xff] %v2305_v23  ;;  %v2318_v25 = vld [vmem:[%s3560_s2 + $0x1f0] sm:$0xff] }
   0x7   :  { %285 = vmatprep.subr.mxu0 %v2237_v9  ;;  %133 = vmatprep.mubr.f32.mxu1 %v3565_v10  ;;  %v2263_v15 = vld [vmem:[%s3560_s2 + $0x180] sm:$0xff]  ;;  %v2268_v16 = vld [vmem:[%s3558_s0 + $0x8] sm:$0xff]  ;;  %v2330_v27 = vld [vmem:[%s3560_s2 + $0x1d8] sm:$0xff] }
   0x8   :  { %286 = vmatpush1.msra.mxu0 %v2243_v11  ;;  %168 = vmatprep.subr.mxu1 %v33_v12  ;;  %v2274_v17 = vld [vmem:[%s3560_s2 + $0x168] sm:$0xff]  ;;  %v2283_v19 = vld [vmem:[%s3560_s2 + $0x160] sm:$0xff]  ;;  %v2342_v29 = vld [vmem:[%s3560_s2 + $0x1d0] sm:$0xff] }
   0x9   :  { %287 = vmatprep.subr.mxu0 %v2253_v13  ;;  %169 = vmatpush1.msra.mxu1 %v32_v14  ;;  %v2294_v21 = vld [vmem:[%s3560_s2 + $0x148] sm:$0xff]  ;;  %v2300_v22 = vld [vmem:[%s3560_s2 + $0x140] sm:$0xff]  ;;  %v2354_v31 = vld [vmem:[%s3560_s2 + $0x1b8] sm:$0xff] }
   0xa   :  { %288 = vmatpush1.msra.mxu0 %v2263_v15  ;;  %1861 = vmatmul.mubr.msk.f32.gmra.mxu1 %vm56_vm0, %v2268_v16  ;;  %v2311_v24 = vld [vmem:[%s3560_s2 + $0x128] sm:$0xff]  ;;  %v2323_v26 = vld [vmem:[%s3560_s2 + $0x120] sm:$0xff]  ;;  %v2366_v33 = vld [vmem:[%s3560_s2 + $0x1b0] sm:$0xff] }
   0xb   :  { %289 = vmatprep.subr.mxu0 %v2274_v17  ;;  %170 = vmatprep.subr.mxu1 %v29_v18  ;;  %v2335_v28 = vld [vmem:[%s3560_s2 + $0x108] sm:$0xff]  ;;  %v2347_v30 = vld [vmem:[%s3560_s2 + $0x100] sm:$0xff]  ;;  %v2378_v35 = vld [vmem:[%s3560_s2 + $0x198] sm:$0xff] }
   0xc   :  { %290 = vmatpush1.msra.mxu0 %v2283_v19  ;;  %171 = vmatpush1.msra.mxu1 %v28_v20  ;;  %v2359_v32 = vld [vmem:[%s3560_s2 + $0xe8] sm:$0xff]  ;;  %v2371_v34 = vld [vmem:[%s3560_s2 + $0xe0] sm:$0xff]  ;;  %v2390_v37 = vld [vmem:[%s3560_s2 + $0x190] sm:$0xff] }
   0xd   :  { %291 = vmatprep.subr.mxu0 %v2294_v21  ;;  %204 = vmatprep.mubr.f32.mxu1 %v3565_v10  ;;  %v2383_v36 = vld [vmem:[%s3560_s2 + $0xc8] sm:$0xff]  ;;  %v2395_v38 = vld [vmem:[%s3560_s2 + $0xc0] sm:$0xff]  ;;  %v2402_v39 = vld [vmem:[%s3560_s2 + $0x178] sm:$0xff] }
   0xe   :  { %292 = vmatpush1.msra.mxu0 %v2300_v22  ;;  %352 = vmatprep.subr.mxu1 %v2305_v23  ;;  %v2407_v40 = vld [vmem:[%s3560_s2 + $0xa8] sm:$0xff]  ;;  %v2414_v41 = vld [vmem:[%s3560_s2 + $0x170] sm:$0xff]  ;;  %v2419_v42 = vld [vmem:[%s3560_s2 + $0xa0] sm:$0xff] }
   0xf   :  { %1862 = vmatmul.mubr.msk.f32.vlgmr.msra.gmra.mxu1 %vm56_vm0, %v24_v8  ;;  %293 = vmatprep.subr.mxu0 %v2311_v24  ;;  %v2426_v43 = vld [vmem:[%s3560_s2 + $0x158] sm:$0xff]  ;;  %v2431_v44 = vld [vmem:[%s3560_s2 + $0x88] sm:$0xff]  ;;  %v2438_v45 = vld [vmem:[%s3560_s2 + $0x150] sm:$0xff] }
  0x10   :  { %353 = vmatpush1.msra.mxu1 %v2318_v25  ;;  %294 = vmatpush1.msra.mxu0 %v2323_v26  ;;  %3664 = vst [vmem:[#allocation8_spill] sm:$0xff] %v2431_v44  ;;  %v2443_v46 = vld [vmem:[%s3560_s2 + $0x80] sm:$0xff]  ;;  %v2450_v47 = vld [vmem:[%s3560_s2 + $0x138] sm:$0xff]  ;;  %v2455_v48 = vld [vmem:[%s3560_s2 + $0x68] sm:$0xff] }
  0x11   :  { %354 = vmatprep.subr.mxu1 %v2330_v27  ;;  %295 = vmatprep.subr.mxu0 %v2335_v28  ;;  %3665 = vst [vmem:[#allocation9_spill] sm:$0xff] %v2443_v46  ;;  %3666 = vst [vmem:[#allocation10_spill] sm:$0xff] %v2455_v48  ;;  %v2462_v49 = vld [vmem:[%s3560_s2 + $0x130] sm:$0xff]  ;;  %v2467_v50 = vld [vmem:[%s3560_s2 + $0x60] sm:$0xff] }
  0x12   :  { %355 = vmatpush1.msra.mxu1 %v2342_v29  ;;  %296 = vmatpush1.msra.mxu0 %v2347_v30  ;;  %3667 = vst [vmem:[#allocation11_spill] sm:$0xff] %v2467_v50  ;;  %v2474_v51 = vld [vmem:[%s3560_s2 + $0x118] sm:$0xff]  ;;  %v2479_v52 = vld [vmem:[%s3560_s2 + $0x48] sm:$0xff] }
  0x13   :  { %356 = vmatprep.subr.mxu1 %v2354_v31  ;;  %297 = vmatprep.subr.mxu0 %v2359_v32  ;;  %3668 = vst [vmem:[#allocation12_spill] sm:$0xff] %v2479_v52 }
  0x14   :  { %357 = vmatpush1.msra.mxu1 %v2366_v33  ;;  %298 = vmatpush1.msra.mxu0 %v2371_v34 }
  0x15   :  { %358 = vmatprep.subr.mxu1 %v2378_v35  ;;  %299 = vmatprep.subr.mxu0 %v2383_v36 }
  0x16   :  { %359 = vmatpush1.msra.mxu1 %v2390_v37  ;;  %300 = vmatpush1.msra.mxu0 %v2395_v38 }
  0x17   :  { %360 = vmatprep.subr.mxu1 %v2402_v39  ;;  %301 = vmatprep.subr.mxu0 %v2407_v40 }
  0x18   :  { %361 = vmatpush1.msra.mxu1 %v2414_v41  ;;  %302 = vmatpush1.msra.mxu0 %v2419_v42 }
  0x19   :  { %362 = vmatprep.subr.mxu1 %v2426_v43  ;;  %303 = vmatprep.subr.mxu0 %v2431_v44 }
  0x1a   :  { %363 = vmatpush1.msra.mxu1 %v2438_v45  ;;  %304 = vmatpush1.msra.mxu0 %v2443_v46 }
  0x1b   :  { %11 = vsyncpa [#allocation3], 0  ;;  %364 = vmatprep.subr.mxu1 %v2450_v47  ;;  %305 = vmatprep.subr.mxu0 %v2455_v48  ;;  %v2486_v53 = vld [vmem:[%s3560_s2 + $0x110] sm:$0xff]  ;;  %v2491_v54 = vld [vmem:[%s3560_s2 + $0x40] sm:$0xff]  ;;  %vm2159_vm1 = vmmov 0   ;;  %s2160_s15 = smov [#allocation2]  }
  0x1c   :  { %3669 = vst [vmem:[#allocation13_spill] sm:$0xff] %v2491_v54  ;;  %365 = vmatpush1.msra.mxu1 %v2462_v49  ;;  %306 = vmatpush1.msra.mxu0 %v2467_v50  ;;  %v2498_v55 = vld [vmem:[%s3560_s2 + $0xf8] sm:$0xff]  ;;  %v2503_v56 = vld [vmem:[%s3560_s2 + $0x28] sm:$0xff]  ;;  %v2510_v57 = vld [vmem:[%s3560_s2 + $0xf0] sm:$0xff]  ;;  %s1852_s16 = sshll.u32 %s2160_s15, 4  ;;  %s1853_s16 = int_to_ptr.vmem [resolvable:$true] %s1852_s16 }
  0x1d   :  { %3670 = vst [vmem:[#allocation14_spill] sm:$0xff] %v2503_v56  ;;  %366 = vmatprep.subr.mxu1 %v2474_v51  ;;  %307 = vmatprep.subr.mxu0 %v2479_v52  ;;  %v2515_v58 = vld [vmem:[%s3560_s2 + $0x20] sm:$0xff]  ;;  %v2522_v59 = vld [vmem:[%s3560_s2 + $0xd8] sm:$0xff]  ;;  %v2527_v60 = vld [vmem:[%s3560_s2 + $0x8] sm:$0xff]  ;;  %s2136_s1 = scalar_lea.vmem %s1853_s16, 32  ;;  %p2141_p1 = scmp.lt.s32.totalorder %s1853_s16, %s1853_s16 }
  0x1e   :  { %3671 = vst [vmem:[#allocation15_spill] sm:$0xff] %v2515_v58  ;;  %367 = vmatpush1.msra.mxu1 %v2486_v53  ;;  %308 = vmatpush1.msra.mxu0 %v2491_v54  ;;  %3672 = vst [vmem:[#allocation16_spill] sm:$0xff] %v2527_v60  ;;  %v2534_v61 = vld [vmem:[%s3560_s2 + $0xd0] sm:$0xff]  ;;  %v2539_v62 = vld [vmem:[%s3560_s2] sm:$0xff]  ;;  %p2137_p0 = scmp.ne.s32.totalorder %s1853_s16, %s2136_s1  ;;  %p2142_p2 = scmp.lt.s32.totalorder %s2136_s1, %s2136_s1 }
  0x1f   :  { %368 = vmatprep.subr.mxu1 %v2498_v55  ;;  %309 = vmatprep.subr.mxu0 %v2503_v56  ;;  %3673 = vst [vmem:[#allocation17_spill] sm:$0xff] %v2539_v62  ;;  %v2546_v63 = vld [vmem:[%s3560_s2 + $0xb8] sm:$0xff]  ;;  %v2553_v0 = vld [vmem:[%s3560_s2 + $0xb0] sm:$0xff] }
  0x20   :  { %369 = vmatpush1.msra.mxu1 %v2510_v57  ;;  %310 = vmatpush1.msra.mxu0 %v2515_v58  ;;  %v2560_v2 = vld [vmem:[%s3560_s2 + $0x98] sm:$0xff]  ;;  %v2567_v4 = vld [vmem:[%s3560_s2 + $0x90] sm:$0xff]  ;;  %p2143_p3 = por %p2142_p2, %p2141_p1 }
  0x21   :  { %370 = vmatprep.subr.mxu1 %v2522_v59  ;;  %311 = vmatprep.subr.mxu0 %v2527_v60  ;;  %3674 = vst [vmem:[#allocation18_spill] sm:$0xff] %v2560_v2  ;;  %3675 = vst [vmem:[#allocation19_spill] sm:$0xff] %v2567_v4  ;;  %v2574_v6 = vld [vmem:[%s3560_s2 + $0x78] sm:$0xff]  ;;  %v2580_v8 = vld [vmem:[%s3560_s2 + $0x70] sm:$0xff] }
  0x22   :  { %371 = vmatpush1.msra.mxu1 %v2534_v61  ;;  %312 = vmatpush1.msra.mxu0 %v2539_v62  ;;  %3676 = vst [vmem:[#allocation20_spill] sm:$0xff] %v2574_v6  ;;  %3677 = vst [vmem:[#allocation21_spill] sm:$0xff] %v2580_v8  ;;  %v2587_v12 = vld [vmem:[%s3560_s2 + $0x58] sm:$0xff]  ;;  %v2594_v14 = vld [vmem:[%s3560_s2 + $0x50] sm:$0xff]  ;;  %p2144_p4 = pnand %p2143_p3, %p2137_p0 }
  0x23   :  { %345 = vmatprep.mubr.f32.mxu0 %v3565_v10  ;;  %372 = vmatprep.subr.mxu1 %v2546_v63  ;;  %3678 = vst [vmem:[#allocation22_spill] sm:$0xff] %v2587_v12  ;;  %3679 = vst [vmem:[#allocation23_spill] sm:$0xff] %v2594_v14  ;;  %v2602_v18 = vld [vmem:[%s3560_s2 + $0x38] sm:$0xff]  ;;  %v2609_v20 = vld [vmem:[%s3560_s2 + $0x30] sm:$0xff] }
  0x24   :  { %346 = vmatmul.mubr.f32.vlgmr.msra.gmra.mxu0 %v3565_v10  ;;  %373 = vmatpush1.msra.mxu1 %v2553_v0  ;;  %3680 = vst [vmem:[#allocation24_spill] sm:$0xff] %v2602_v18  ;;  %3681 = vst [vmem:[#allocation25_spill] sm:$0xff] %v2609_v20 }
  0x25   :  { %374 = vmatprep.subr.mxu1 %v2560_v2  ;;  %210 = vmatprep.mubr.f32.mxu1 %v3565_v10 }
  0x26   :  { %375 = vmatpush1.msra.mxu1 %v2567_v4  ;;  %451 = vmatprep.subr.mxu0 %v2202_v1 }
  0x27   :  { %376 = vmatprep.subr.mxu1 %v2574_v6  ;;  %1863 = vmatmul.mubr.msk.f32.gmra.mxu1 %vm56_vm0, %v2268_v16  ;;  %v2616_v16 = vld [vmem:[%s3560_s2 + $0x18] sm:$0xff] }
  0x28   :  { %377 = vmatpush1.msra.mxu1 %v2580_v8  ;;  %416 = vmatprep.mubr.f32.mxu1 %v3565_v10  ;;  %3682 = vst [vmem:[#allocation26_spill] sm:$0xff] %v2616_v16  ;;  %v2623_v10 = vld [vmem:[%s3560_s2 + $0x10] sm:$0xff] }
  0x29   :  { %378 = vmatprep.subr.mxu1 %v2587_v12  ;;  %452 = vmatpush1.msra.mxu0 %v2211_v3  ;;  %3683 = vst [vmem:[#allocation27_spill] sm:$0xff] %v2623_v10 }
  0x2a   :  { %379 = vmatpush1.msra.mxu1 %v2594_v14  ;;  %453 = vmatprep.subr.mxu0 %v2219_v5  ;;  %v3684_v5 = vmov 0.0  }
  0x2b   :  { %380 = vmatprep.subr.mxu1 %v2602_v18  ;;  %454 = vmatpush1.msra.mxu0 %v2228_v7 }
  0x2c   :  { %381 = vmatpush1.msra.mxu1 %v2609_v20  ;;  %455 = vmatprep.subr.mxu0 %v2237_v9 }
  0x2d   :  { %382 = vmatprep.subr.mxu1 %v2616_v16  ;;  %456 = vmatpush1.msra.mxu0 %v2243_v11 }
  0x2e   :  { %383 = vmatpush1.msra.mxu1 %v2623_v10  ;;  %457 = vmatprep.subr.mxu0 %v2253_v13 }
  0x2f   :  { %417 = vmatmul.mubr.f32.vlgmr.msra.gmra.mxu1 %v3684_v5  ;;  %522 = vmatprep.subr.mxu1 %v2305_v23 }
  0x30   :  { %523 = vmatpush1.msra.mxu1 %v2318_v25  ;;  %458 = vmatpush1.msra.mxu0 %v2263_v15 }
  0x31   :  { %524 = vmatprep.subr.mxu1 %v2330_v27  ;;  %459 = vmatprep.subr.mxu0 %v2274_v17 }
  0x32   :  { %525 = vmatpush1.msra.mxu1 %v2342_v29  ;;  %460 = vmatpush1.msra.mxu0 %v2283_v19 }
  0x33   :  { %526 = vmatprep.subr.mxu1 %v2354_v31  ;;  %461 = vmatprep.subr.mxu0 %v2294_v21 }
  0x34   :  { %527 = vmatpush1.msra.mxu1 %v2366_v33  ;;  %462 = vmatpush1.msra.mxu0 %v2300_v22 }
  0x35   :  { %528 = vmatprep.subr.mxu1 %v2378_v35  ;;  %463 = vmatprep.subr.mxu0 %v2311_v24 }
  0x36   :  { %529 = vmatpush1.msra.mxu1 %v2390_v37  ;;  %464 = vmatpush1.msra.mxu0 %v2323_v26 }
  0x37   :  { %530 = vmatprep.subr.mxu1 %v2402_v39  ;;  %465 = vmatprep.subr.mxu0 %v2335_v28 }
  0x38   :  { %531 = vmatpush1.msra.mxu1 %v2414_v41  ;;  %466 = vmatpush1.msra.mxu0 %v2347_v30 }
  0x39   :  { %532 = vmatprep.subr.mxu1 %v2426_v43  ;;  %467 = vmatprep.subr.mxu0 %v2359_v32 }
  0x3a   :  { %533 = vmatpush1.msra.mxu1 %v2438_v45  ;;  %468 = vmatpush1.msra.mxu0 %v2371_v34 }
  0x3b   :  { %534 = vmatprep.subr.mxu1 %v2450_v47  ;;  %469 = vmatprep.subr.mxu0 %v2383_v36 }
  0x3c   :  { %535 = vmatpush1.msra.mxu1 %v2462_v49  ;;  %470 = vmatpush1.msra.mxu0 %v2395_v38 }
  0x3d   :  { %536 = vmatprep.subr.mxu1 %v2474_v51  ;;  %471 = vmatprep.subr.mxu0 %v2407_v40 }
  0x3e   :  { %537 = vmatpush1.msra.mxu1 %v2486_v53  ;;  %472 = vmatpush1.msra.mxu0 %v2419_v42 }
  0x3f   :  { %538 = vmatprep.subr.mxu1 %v2498_v55  ;;  %473 = vmatprep.subr.mxu0 %v2431_v44 }
  0x40   :  { %539 = vmatpush1.msra.mxu1 %v2510_v57  ;;  %474 = vmatpush1.msra.mxu0 %v2443_v46 }
  0x41   :  { %540 = vmatprep.subr.mxu1 %v2522_v59  ;;  %475 = vmatprep.subr.mxu0 %v2455_v48 }
  0x42   :  { %541 = vmatpush1.msra.mxu1 %v2534_v61  ;;  %476 = vmatpush1.msra.mxu0 %v2467_v50 }
  0x43   :  { %542 = vmatprep.subr.mxu1 %v2546_v63  ;;  %477 = vmatprep.subr.mxu0 %v2479_v52 }
  0x44   :  { %543 = vmatpush1.msra.mxu1 %v2553_v0  ;;  %478 = vmatpush1.msra.mxu0 %v2491_v54 }
  0x45   :  { %544 = vmatprep.subr.mxu1 %v2560_v2  ;;  %479 = vmatprep.subr.mxu0 %v2503_v56  ;;  %v34_v56 = vld [vmem:[%s3561_s3] sm:$0xf] }
  0x46   :  { %545 = vmatpush1.msra.mxu1 %v2567_v4  ;;  %480 = vmatpush1.msra.mxu0 %v2515_v58 }
  0x47   :  { %546 = vmatprep.subr.mxu1 %v2574_v6  ;;  %481 = vmatprep.subr.mxu0 %v2527_v60 }
  0x48   :  { %547 = vmatpush1.msra.mxu1 %v2580_v8  ;;  %482 = vmatpush1.msra.mxu0 %v2539_v62  ;;  %v36_v62 = vlaneseq }
  0x49   :  { %548 = vmatprep.subr.mxu1 %v2587_v12  ;;  %515 = vmatprep.mubr.f32.mxu0 %v3684_v5 }
  0x4a   :  { %549 = vmatpush1.msra.mxu1 %v2594_v14  ;;  %586 = vmatprep.mubr.f32.mxu1 %v3684_v5  ;;  %v37_v60 = vshrl.u32 %v36_v62, 7 }
  0x4b   :  { %550 = vmatprep.subr.mxu1 %v2602_v18  ;;  %639 = vmatprep.subr.mxu0 %v2202_v1 }
  0x4c   :  { %551 = vmatpush1.msra.mxu1 %v2609_v20  ;;  %v38_v58 = vsub.s32 0, %v37_v60  ;;  %v42_v14 = vsub.s32 1, %v37_v60  ;;  %v50_v62 = vsub.s32 3, %v37_v60 }
  0x4d   :  { %552 = vmatprep.subr.mxu1 %v2616_v16 }
  0x4e   :  { %553 = vmatpush1.msra.mxu1 %v2623_v10  ;;  %v39_v54 = vrot.slane %v34_v56, %v38_v58  ;;  %v43_v12 = vrot.slane %v34_v56, %v42_v14 }
  0x4f   :  { %710 = vmatprep.subr.mxu1 %v2305_v23  ;;  %v46_v23 = vsub.s32 2, %v37_v60 }
  0x51   :  { %v47_v46 = vrot.slane %v34_v56, %v46_v23 }
  0xc6   :  { %v129_v5 = vpop.f32.mrf.mxu1 }
  0xc7   :  { %v2701_v8 = vadd.f32 %v129_v5, %v39_v54 }
  0xc8   :  { %v131_v18 = vpop.f32.mrf.mxu1 }
  0xc9   :  { %v2703_v6 = vadd.f32 %v131_v18, %v43_v12 }
  0xca   :  { %v135_v1 = vpop.f32.mrf.mxu1 }
  0xcb   :  { %v2697_v20 = vadd.f32 %v135_v1, %v39_v54 }
  0xcc   :  { %v137_v16 = vpop.f32.mrf.mxu1 }
  0xcd   :  { %3685 = vst [vmem:[#allocation28_spill] sm:$0xff] %v2697_v20  ;;  %v2699_v52 = vadd.f32 %v137_v16, %v43_v12  ;;  %v51_v20 = vrot.slane %v34_v56, %v50_v62 }
  0xcf   :  { %3686 = vst [vmem:[#allocation29_spill] sm:$0xff] %v2699_v52  ;;  %v206_v10 = vpop.f32.mrf.mxu1 }
  0xd1   :  { %v208_v48 = vpop.f32.mrf.mxu1 }
  0xd2   :  { %v2711_v12 = vadd.f32 %v208_v48, %v51_v20 }
  0xe4   :  { %v347_v50 = vpop.f32.mrf.mxu0 }
  0xe5   :  { %v423_v4 = vadd.f32 %v347_v50, %v2701_v8  ;;  %v2714_v50 = vadd.f32 %v206_v10, %v47_v46 }
  0xe6   :  { %v349_v58 = vpop.f32.mrf.mxu0 }
  0xe7   :  { %v1864_v2 = vmul.f32 -1.442695, %v423_v4  ;;  %v424_v1 = vadd.f32 %v349_v58, %v2703_v6  ;;  %v212_v14 = vpop.f32.mrf.mxu1 }
  0xe8   :  { %v2707_v16 = vadd.f32 %v212_v14, %v47_v46 }
  0xe9   :  { %1944 = vpow2.f32 %v1864_v2  ;;  %v1865_v52 = vmul.f32 -1.442695, %v424_v1  ;;  %v214_v5 = vpop.f32.mrf.mxu1 }
  0xea   :  { %3687 = vst [vmem:[#allocation30_spill] sm:$0xff] %v2707_v16  ;;  %v2709_v54 = vadd.f32 %v214_v5, %v51_v20 }
  0xeb   :  { %1946 = vpow2.f32 %v1865_v52 }
  0xec   :  { %3688 = vst [vmem:[#allocation31_spill] sm:$0xff] %v2709_v54  ;;  %v3705_v54 = vld [vmem:[#allocation16_spill] sm:$0xff] }
  0xef   :  { %v418_v60 = vpop.f32.mrf.mxu1 }
  0xf0   :  { %v425_v56 = vadd.f32 %v418_v60, %v2714_v50 }
  0xf1   :  { %v420_v18 = vpop.f32.mrf.mxu1 }
  0xf2   :  { %v426_v23 = vadd.f32 %v420_v18, %v2711_v12 }
  0xf4   :  { %v1866_v4 = vmul.f32 -1.442695, %v426_v23 }
  0xf6   :  { %v1945_v58 = vpop.eup %1944  ;;  %1948 = vpow2.f32 %v1866_v4  ;;  %v3689_v4 = vld [vmem:[#allocation6_spill] sm:$0xff] }
  0xf7   :  { %v430_v62 = vadd.f32 1.0, %v1945_v58  ;;  %v3691_v58 = vld [vmem:[#allocation9_spill] sm:$0xff] }
  0xf8   :  { %v1947_v14 = vpop.eup %1946 }
  0xf9   :  { %1950 = vrcp.f32 %v430_v62  ;;  %v436_v2 = vadd.f32 1.0, %v1947_v14  ;;  %v3693_v62 = vld [vmem:[#allocation10_spill] sm:$0xff]  ;;  %v3694_v14 = vld [vmem:[#allocation20_spill] sm:$0xff] }
  0xfa   :  { %1952 = vtanh.f32 %v425_v56  ;;  %v3692_v56 = vld [vmem:[#allocation19_spill] sm:$0xff] }
  0xfb   :  { %1954 = vrcp.f32 %v436_v2  ;;  %v3695_v2 = vld [vmem:[#allocation11_spill] sm:$0xff] }
 0x103   :  { %v1949_v52 = vpop.eup %1948 }
 0x104   :  { %v443_v5 = vadd.f32 1.0, %v1949_v52  ;;  %v3696_v52 = vld [vmem:[#allocation21_spill] sm:$0xff] }
 0x106   :  { %v1951_v1 = vpop.eup %1950  ;;  %1956 = vrcp.f32 %v443_v5  ;;  %v3700_v5 = vld [vmem:[#allocation23_spill] sm:$0xff] }
 0x107   :  { %v1953_v48 = vpop.eup %1952 }
 0x108   :  { %v1955_v20 = vpop.eup %1954  ;;  %v447_v18 = vmul.f32 %v1953_v48, %v1951_v1  ;;  %v3697_v1 = vld [vmem:[#allocation12_spill] sm:$0xff]  ;;  %v3698_v48 = vld [vmem:[#allocation22_spill] sm:$0xff] }
 0x109   :  { %v446_v16 = vmul.f32 0.0, %v1955_v20  ;;  %v3699_v20 = vld [vmem:[#allocation13_spill] sm:$0xff] }
 0x10b   :  { %v2717_v10 = vadd.f32 %v447_v18, %v446_v16  ;;  %v3690_v16 = vld [vmem:[#allocation18_spill] sm:$0xff] }
 0x10c   :  { %v3701_v18 = vld [vmem:[#allocation14_spill] sm:$0xff] }
 0x10d   :  { %1958 = vtanh.f32 %v2717_v10 }
 0x113   :  { %v1957_v46 = vpop.eup %1956 }
 0x11a   :  { %v1959_v60 = vpop.eup %1958 }
 0x11b   :  { %v450_v23 = vmul.f32 %v1959_v60, %v1957_v46  ;;  %v3702_v46 = vld [vmem:[#allocation24_spill] sm:$0xff]  ;;  %v3703_v60 = vld [vmem:[#allocation15_spill] sm:$0xff] }
 0x11d   :  { %516 = vmatmul.mubr.f32.vlgmr.msra.gmra.mxu0 %v450_v23  ;;  %587 = vmatmul.mubr.f32.vlgmr.msra.gmra.mxu1 %v450_v23  ;;  %v3704_v23 = vld [vmem:[#allocation25_spill] sm:$0xff] }
 0x11e   :  { %640 = vmatpush1.msra.mxu0 %v2211_v3  ;;  %711 = vmatpush1.msra.mxu1 %v2318_v25 }
 0x11f   :  { %641 = vmatprep.subr.mxu0 %v3689_v4  ;;  %712 = vmatprep.subr.mxu1 %v2330_v27 }
 0x120   :  { %642 = vmatpush1.msra.mxu0 %v2228_v7  ;;  %713 = vmatpush1.msra.mxu1 %v2342_v29 }
 0x121   :  { %643 = vmatprep.subr.mxu0 %v2237_v9  ;;  %714 = vmatprep.subr.mxu1 %v2354_v31 }
 0x122   :  { %644 = vmatpush1.msra.mxu0 %v2243_v11  ;;  %715 = vmatpush1.msra.mxu1 %v2366_v33 }
 0x123   :  { %645 = vmatprep.subr.mxu0 %v2253_v13  ;;  %716 = vmatprep.subr.mxu1 %v2378_v35 }
 0x124   :  { %646 = vmatpush1.msra.mxu0 %v2263_v15  ;;  %717 = vmatpush1.msra.mxu1 %v2390_v37 }
 0x125   :  { %647 = vmatprep.subr.mxu0 %v2274_v17  ;;  %718 = vmatprep.subr.mxu1 %v2402_v39 }
 0x126   :  { %648 = vmatpush1.msra.mxu0 %v2283_v19  ;;  %719 = vmatpush1.msra.mxu1 %v2414_v41 }
 0x127   :  { %649 = vmatprep.subr.mxu0 %v2294_v21  ;;  %720 = vmatprep.subr.mxu1 %v2426_v43 }
 0x128   :  { %650 = vmatpush1.msra.mxu0 %v2300_v22  ;;  %721 = vmatpush1.msra.mxu1 %v2438_v45 }
 0x129   :  { %651 = vmatprep.subr.mxu0 %v2311_v24  ;;  %722 = vmatprep.subr.mxu1 %v2450_v47 }
 0x12a   :  { %652 = vmatpush1.msra.mxu0 %v2323_v26  ;;  %723 = vmatpush1.msra.mxu1 %v2462_v49 }
 0x12b   :  { %653 = vmatprep.subr.mxu0 %v2335_v28  ;;  %724 = vmatprep.subr.mxu1 %v2474_v51 }
 0x12c   :  { %654 = vmatpush1.msra.mxu0 %v2347_v30  ;;  %725 = vmatpush1.msra.mxu1 %v2486_v53 }
 0x12d   :  { %655 = vmatprep.subr.mxu0 %v2359_v32  ;;  %726 = vmatprep.subr.mxu1 %v2498_v55 }
 0x12e   :  { %656 = vmatpush1.msra.mxu0 %v2371_v34  ;;  %727 = vmatpush1.msra.mxu1 %v2510_v57 }
 0x12f   :  { %657 = vmatprep.subr.mxu0 %v2383_v36  ;;  %728 = vmatprep.subr.mxu1 %v2522_v59 }
 0x130   :  { %658 = vmatpush1.msra.mxu0 %v2395_v38  ;;  %729 = vmatpush1.msra.mxu1 %v2534_v61 }
 0x131   :  { %659 = vmatprep.subr.mxu0 %v2407_v40  ;;  %730 = vmatprep.subr.mxu1 %v2546_v63 }
 0x132   :  { %660 = vmatpush1.msra.mxu0 %v2419_v42  ;;  %731 = vmatpush1.msra.mxu1 %v2553_v0 }
 0x133   :  { %661 = vmatprep.subr.mxu0 %v2431_v44  ;;  %732 = vmatprep.subr.mxu1 %v3690_v16 }
 0x134   :  { %662 = vmatpush1.msra.mxu0 %v3691_v58  ;;  %733 = vmatpush1.msra.mxu1 %v3692_v56 }
 0x135   :  { %663 = vmatprep.subr.mxu0 %v3693_v62  ;;  %734 = vmatprep.subr.mxu1 %v3694_v14 }
 0x136   :  { %664 = vmatpush1.msra.mxu0 %v3695_v2  ;;  %735 = vmatpush1.msra.mxu1 %v3696_v52  ;;  %v3706_v2 = vld [vmem:[#allocation26_spill] sm:$0xff]  ;;  %v3707_v52 = vld [vmem:[#allocation17_spill] sm:$0xff] }
 0x137   :  { %665 = vmatprep.subr.mxu0 %v3697_v1  ;;  %736 = vmatprep.subr.mxu1 %v3698_v48  ;;  %v3708_v1 = vmov 0.0   ;;  %v3709_v48 = vld [vmem:[#allocation27_spill] sm:$0xff] }
 0x138   :  { %666 = vmatpush1.msra.mxu0 %v3699_v20  ;;  %737 = vmatpush1.msra.mxu1 %v3700_v5  ;;  %v3710_v5 = vld [vmem:[#allocation5_spill] sm:$0xff] }
 0x139   :  { %667 = vmatprep.subr.mxu0 %v3701_v18  ;;  %738 = vmatprep.subr.mxu1 %v3702_v46  ;;  %v3711_v18 = vld [vmem:[#allocation7_spill] sm:$0xff] }
 0x13a   :  { %668 = vmatpush1.msra.mxu0 %v3703_v60  ;;  %739 = vmatpush1.msra.mxu1 %v3704_v23 }
 0x13b   :  { %669 = vmatprep.subr.mxu0 %v3705_v54  ;;  %740 = vmatprep.subr.mxu1 %v3706_v2 }
 0x13c   :  { %670 = vmatpush1.msra.mxu0 %v3707_v52  ;;  %703 = vmatprep.mubr.f32.mxu0 %v3708_v1 }
 0x13d   :  { %741 = vmatpush1.msra.mxu1 %v3709_v48  ;;  %774 = vmatprep.mubr.f32.mxu1 %v3708_v1 }
 0x13e   :  { %827 = vmatprep.subr.mxu0 %v3710_v5  ;;  %898 = vmatprep.subr.mxu1 %v3711_v18 }
 0x1dd   :  { %v517_v46 = vpop.f32.mrf.mxu0  ;;  %v588_v54 = vpop.f32.mrf.mxu1 }
 0x1de   :  { %v597_v60 = vrot.slane %v517_v46, 6  ;;  %v599_v5 = vrot.slane %v588_v54, 6 }
 0x1df   :  { %v519_v20 = vpop.f32.mrf.mxu0  ;;  %v590_v56 = vpop.f32.mrf.mxu1 }
 0x1e0   :  { %v605_v23 = vadd.f32 %v597_v60, %v2701_v8  ;;  %v598_v14 = vrot.slane %v519_v20, 6  ;;  %v600_v48 = vrot.slane %v590_v56, 6  ;;  %v607_v46 = vadd.f32 %v599_v5, %v2714_v50 }
 0x1e2   :  { %v1867_v2 = vmul.f32 -1.442695, %v605_v23  ;;  %v606_v52 = vadd.f32 %v598_v14, %v2703_v6  ;;  %v608_v1 = vadd.f32 %v600_v48, %v2711_v12  ;;  %v3714_v23 = vld [vmem:[#allocation9_spill] sm:$0xff] }
 0x1e4   :  { %1960 = vpow2.f32 %v1867_v2  ;;  %v1868_v62 = vmul.f32 -1.442695, %v606_v52  ;;  %v1869_v58 = vmul.f32 -1.442695, %v608_v1 }
 0x1e6   :  { %1962 = vpow2.f32 %v1868_v62  ;;  %v629_v62 = vrot.slane %v2717_v10, 6  ;;  %v3712_v10 = vld [vmem:[#allocation8_spill] sm:$0xff] }
 0x1e7   :  { %1964 = vpow2.f32 %v1869_v58 }
 0x1f1   :  { %v1961_v18 = vpop.eup %1960 }
 0x1f2   :  { %v612_v16 = vadd.f32 1.0, %v1961_v18  ;;  %v3713_v18 = vld [vmem:[#allocation18_spill] sm:$0xff] }
 0x1f3   :  { %v1963_v44 = vpop.eup %1962 }
 0x1f4   :  { %1966 = vrcp.f32 %v612_v16  ;;  %v618_v20 = vadd.f32 1.0, %v1963_v44  ;;  %v1965_v14 = vpop.eup %1964 }
 0x1f5   :  { %1968 = vtanh.f32 %v607_v46  ;;  %v625_v60 = vadd.f32 1.0, %v1965_v14  ;;  %v3715_v46 = vld [vmem:[#allocation19_spill] sm:$0xff]  ;;  %v3717_v14 = vld [vmem:[#allocation20_spill] sm:$0xff] }
 0x1f6   :  { %1970 = vrcp.f32 %v618_v20  ;;  %v3716_v20 = vld [vmem:[#allocation10_spill] sm:$0xff] }
 0x1f7   :  { %1972 = vrcp.f32 %v625_v60  ;;  %v3722_v60 = vld [vmem:[#allocation13_spill] sm:$0xff] }
 0x201   :  { %v1967_v2 = vpop.eup %1966 }
 0x202   :  { %v1969_v52 = vpop.eup %1968 }
 0x203   :  { %v1971_v56 = vpop.eup %1970  ;;  %v632_v48 = vmul.f32 %v1969_v52, %v1967_v2  ;;  %v3718_v2 = vld [vmem:[#allocation11_spill] sm:$0xff]  ;;  %v3719_v52 = vld [vmem:[#allocation21_spill] sm:$0xff] }
 0x204   :  { %v631_v54 = vmul.f32 %v1971_v56, %v629_v62  ;;  %v1973_v5 = vpop.eup %1972  ;;  %v3720_v62 = vld [vmem:[#allocation12_spill] sm:$0xff]  ;;  %v3721_v56 = vld [vmem:[#allocation22_spill] sm:$0xff] }
 0x206   :  { %v2791_v1 = vadd.f32 %v632_v48, %v631_v54  ;;  %v3723_v48 = vld [vmem:[#allocation23_spill] sm:$0xff]  ;;  %v3724_v54 = vld [vmem:[#allocation14_spill] sm:$0xff] }
 0x208   :  { %1974 = vtanh.f32 %v2791_v1 }
 0x215   :  { %v1975_v58 = vpop.eup %1974 }
 0x216   :  { %v635_v16 = vmul.f32 %v1975_v58, %v1973_v5  ;;  %v3725_v5 = vld [vmem:[#allocation24_spill] sm:$0xff]  ;;  %v3726_v58 = vld [vmem:[#allocation15_spill] sm:$0xff] }
 0x218   :  { %v637_v44 = vrot.slane %v635_v16, 2  ;;  %v3727_v16 = vld [vmem:[#allocation25_spill] sm:$0xff] }
 0x21a   :  { %704 = vmatmul.mubr.f32.vlgmr.msra.gmra.mxu0 %v637_v44  ;;  %775 = vmatmul.mubr.f32.vlgmr.msra.gmra.mxu1 %v637_v44  ;;  %v3728_v44 = vld [vmem:[#allocation16_spill] sm:$0xff] }
 0x21b   :  { %828 = vmatpush1.msra.mxu0 %v2211_v3  ;;  %899 = vmatpush1.msra.mxu1 %v2318_v25 }
 0x21c   :  { %829 = vmatprep.subr.mxu0 %v3689_v4  ;;  %900 = vmatprep.subr.mxu1 %v2330_v27 }
 0x21d   :  { %830 = vmatpush1.msra.mxu0 %v2228_v7  ;;  %901 = vmatpush1.msra.mxu1 %v2342_v29 }
 0x21e   :  { %831 = vmatprep.subr.mxu0 %v2237_v9  ;;  %902 = vmatprep.subr.mxu1 %v2354_v31 }
 0x21f   :  { %832 = vmatpush1.msra.mxu0 %v2243_v11  ;;  %903 = vmatpush1.msra.mxu1 %v2366_v33 }
 0x220   :  { %833 = vmatprep.subr.mxu0 %v2253_v13  ;;  %904 = vmatprep.subr.mxu1 %v2378_v35 }
 0x221   :  { %834 = vmatpush1.msra.mxu0 %v2263_v15  ;;  %905 = vmatpush1.msra.mxu1 %v2390_v37 }
 0x222   :  { %835 = vmatprep.subr.mxu0 %v2274_v17  ;;  %906 = vmatprep.subr.mxu1 %v2402_v39 }
 0x223   :  { %836 = vmatpush1.msra.mxu0 %v2283_v19  ;;  %907 = vmatpush1.msra.mxu1 %v2414_v41 }
 0x224   :  { %837 = vmatprep.subr.mxu0 %v2294_v21  ;;  %908 = vmatprep.subr.mxu1 %v2426_v43 }
 0x225   :  { %838 = vmatpush1.msra.mxu0 %v2300_v22  ;;  %909 = vmatpush1.msra.mxu1 %v2438_v45 }
 0x226   :  { %839 = vmatprep.subr.mxu0 %v2311_v24  ;;  %910 = vmatprep.subr.mxu1 %v2450_v47 }
 0x227   :  { %840 = vmatpush1.msra.mxu0 %v2323_v26  ;;  %911 = vmatpush1.msra.mxu1 %v2462_v49 }
 0x228   :  { %841 = vmatprep.subr.mxu0 %v2335_v28  ;;  %912 = vmatprep.subr.mxu1 %v2474_v51 }
 0x229   :  { %842 = vmatpush1.msra.mxu0 %v2347_v30  ;;  %913 = vmatpush1.msra.mxu1 %v2486_v53 }
 0x22a   :  { %843 = vmatprep.subr.mxu0 %v2359_v32  ;;  %914 = vmatprep.subr.mxu1 %v2498_v55 }
 0x22b   :  { %844 = vmatpush1.msra.mxu0 %v2371_v34  ;;  %915 = vmatpush1.msra.mxu1 %v2510_v57 }
 0x22c   :  { %845 = vmatprep.subr.mxu0 %v2383_v36  ;;  %916 = vmatprep.subr.mxu1 %v2522_v59 }
 0x22d   :  { %846 = vmatpush1.msra.mxu0 %v2395_v38  ;;  %917 = vmatpush1.msra.mxu1 %v2534_v61 }
 0x22e   :  { %847 = vmatprep.subr.mxu0 %v2407_v40  ;;  %918 = vmatprep.subr.mxu1 %v2546_v63 }
 0x22f   :  { %848 = vmatpush1.msra.mxu0 %v2419_v42  ;;  %919 = vmatpush1.msra.mxu1 %v2553_v0 }
 0x230   :  { %849 = vmatprep.subr.mxu0 %v3712_v10  ;;  %920 = vmatprep.subr.mxu1 %v3713_v18 }
 0x231   :  { %850 = vmatpush1.msra.mxu0 %v3714_v23  ;;  %921 = vmatpush1.msra.mxu1 %v3715_v46 }
 0x232   :  { %851 = vmatprep.subr.mxu0 %v3716_v20  ;;  %922 = vmatprep.subr.mxu1 %v3717_v14 }
 0x233   :  { %852 = vmatpush1.msra.mxu0 %v3718_v2  ;;  %923 = vmatpush1.msra.mxu1 %v3719_v52  ;;  %v3729_v2 = vld [vmem:[#allocation26_spill] sm:$0xff]  ;;  %v3730_v52 = vld [vmem:[#allocation17_spill] sm:$0xff] }
 0x234   :  { %853 = vmatprep.subr.mxu0 %v3720_v62  ;;  %924 = vmatprep.subr.mxu1 %v3721_v56  ;;  %v3731_v62 = vmov 0.0   ;;  %v3732_v56 = vld [vmem:[#allocation27_spill] sm:$0xff] }
 0x235   :  { %854 = vmatpush1.msra.mxu0 %v3722_v60  ;;  %925 = vmatpush1.msra.mxu1 %v3723_v48  ;;  %v3733_v48 = vld [vmem:[#allocation5_spill] sm:$0xff] }
 0x236   :  { %855 = vmatprep.subr.mxu0 %v3724_v54  ;;  %926 = vmatprep.subr.mxu1 %v3725_v5  ;;  %v3734_v54 = vld [vmem:[#allocation7_spill] sm:$0xff] }
 0x237   :  { %856 = vmatpush1.msra.mxu0 %v3726_v58  ;;  %927 = vmatpush1.msra.mxu1 %v3727_v16 }
 0x238   :  { %857 = vmatprep.subr.mxu0 %v3728_v44  ;;  %928 = vmatprep.subr.mxu1 %v3729_v2 }
 0x239   :  { %858 = vmatpush1.msra.mxu0 %v3730_v52  ;;  %891 = vmatprep.mubr.f32.mxu0 %v3731_v62 }
 0x23a   :  { %929 = vmatpush1.msra.mxu1 %v3732_v56  ;;  %962 = vmatprep.mubr.f32.mxu1 %v3731_v62 }
 0x23b   :  { %1015 = vmatprep.subr.mxu0 %v3733_v48  ;;  %1086 = vmatprep.subr.mxu1 %v3734_v54 }
 0x2da   :  { %v705_v5 = vpop.f32.mrf.mxu0  ;;  %v776_v44 = vpop.f32.mrf.mxu1 }
 0x2db   :  { %v785_v58 = vrot.slane %v705_v5, 4  ;;  %v787_v48 = vrot.slane %v776_v44, 4 }
 0x2dc   :  { %v707_v60 = vpop.f32.mrf.mxu0  ;;  %v778_v46 = vpop.f32.mrf.mxu1 }
 0x2dd   :  { %v793_v16 = vadd.f32 %v785_v58, %v2701_v8  ;;  %v786_v14 = vrot.slane %v707_v60, 4  ;;  %v788_v56 = vrot.slane %v778_v46, 4  ;;  %v795_v5 = vadd.f32 %v787_v48, %v2714_v50 }
 0x2df   :  { %v1870_v2 = vmul.f32 -1.442695, %v793_v16  ;;  %v794_v52 = vadd.f32 %v786_v14, %v2703_v6  ;;  %v796_v62 = vadd.f32 %v788_v56, %v2711_v12 }
 0x2e1   :  { %1976 = vpow2.f32 %v1870_v2  ;;  %v1871_v20 = vmul.f32 -1.442695, %v794_v52  ;;  %v1872_v23 = vmul.f32 -1.442695, %v796_v62 }
 0x2e3   :  { %1978 = vpow2.f32 %v1871_v20  ;;  %v817_v20 = vrot.slane %v2791_v1, 6 }
 0x2e4   :  { %1980 = vpow2.f32 %v1872_v23 }
 0x2ee   :  { %v1977_v54 = vpop.eup %1976 }
 0x2ef   :  { %v800_v18 = vadd.f32 1.0, %v1977_v54 }
 0x2f0   :  { %v1979_v10 = vpop.eup %1978 }
 0x2f1   :  { %1982 = vrcp.f32 %v800_v18  ;;  %v806_v60 = vadd.f32 1.0, %v1979_v10  ;;  %v1981_v14 = vpop.eup %1980 }
 0x2f2   :  { %1984 = vtanh.f32 %v795_v5  ;;  %v813_v58 = vadd.f32 1.0, %v1981_v14 }
 0x2f3   :  { %1986 = vrcp.f32 %v806_v60 }
 0x2f4   :  { %1988 = vrcp.f32 %v813_v58  ;;  %v2961_v58 = vld [vmem:[%s3560_s2 + $0x1f0] sm:$0xff] }
 0x2fe   :  { %v1983_v2 = vpop.eup %1982 }
 0x2ff   :  { %v1985_v52 = vpop.eup %1984 }
 0x300   :  { %v1987_v46 = vpop.eup %1986  ;;  %v820_v56 = vmul.f32 %v1985_v52, %v1983_v2 }
 0x301   :  { %v819_v16 = vmul.f32 %v1987_v46, %v817_v20  ;;  %v1989_v44 = vpop.eup %1988  ;;  %v2955_v46 = vld [vmem:[%s3560_s2 + $0x1e0] sm:$0xff] }
 0x303   :  { %v2865_v62 = vadd.f32 %v820_v56, %v819_v16  ;;  %v2967_v56 = vld [vmem:[%s3560_s2 + $0x1c8] sm:$0xff]  ;;  %v2973_v16 = vld [vmem:[%s3560_s2 + $0x1d8] sm:$0xff] }
 0x305   :  { %1990 = vtanh.f32 %v2865_v62  ;;  %v1005_v48 = vrot.slane %v2865_v62, 6  ;;  %v2979_v62 = vld [vmem:[%s3560_s2 + $0x1c0] sm:$0xff] }
 0x312   :  { %v1991_v23 = vpop.eup %1990 }
 0x313   :  { %v823_v18 = vmul.f32 %v1991_v23, %v1989_v44  ;;  %v2985_v44 = vld [vmem:[%s3560_s2 + $0x1d0] sm:$0xff]  ;;  %v2991_v23 = vld [vmem:[%s3560_s2 + $0x1a8] sm:$0xff] }
 0x315   :  { %v825_v10 = vrot.slane %v823_v18, 4  ;;  %v2997_v18 = vld [vmem:[%s3560_s2 + $0x1b8] sm:$0xff] }
 0x317   :  { %892 = vmatmul.mubr.f32.vlgmr.msra.gmra.mxu0 %v825_v10  ;;  %963 = vmatmul.mubr.f32.vlgmr.msra.gmra.mxu1 %v825_v10  ;;  %v3003_v10 = vld [vmem:[%s3560_s2 + $0x1a0] sm:$0xff] }
 0x318   :  { %1016 = vmatpush1.msra.mxu0 %v2211_v3  ;;  %1087 = vmatpush1.msra.mxu1 %v2318_v25  ;;  %v3735_v3 = vld [vmem:[#allocation8_spill] sm:$0xff]  ;;  %v3746_v25 = vld [vmem:[#allocation23_spill] sm:$0xff] }
 0x319   :  { %1017 = vmatprep.subr.mxu0 %v3689_v4  ;;  %1088 = vmatprep.subr.mxu1 %v2330_v27  ;;  %v3748_v27 = vld [vmem:[#allocation24_spill] sm:$0xff] }
 0x31a   :  { %1018 = vmatpush1.msra.mxu0 %v2228_v7  ;;  %1089 = vmatpush1.msra.mxu1 %v2342_v29  ;;  %v3736_v7 = vld [vmem:[#allocation18_spill] sm:$0xff]  ;;  %v3750_v29 = vld [vmem:[#allocation25_spill] sm:$0xff] }
 0x31b   :  { %1019 = vmatprep.subr.mxu0 %v2237_v9  ;;  %1090 = vmatprep.subr.mxu1 %v2354_v31  ;;  %v3737_v9 = vld [vmem:[#allocation9_spill] sm:$0xff]  ;;  %v3752_v31 = vld [vmem:[#allocation26_spill] sm:$0xff] }
 0x31c   :  { %1020 = vmatpush1.msra.mxu0 %v2243_v11  ;;  %1091 = vmatpush1.msra.mxu1 %v2366_v33  ;;  %v3738_v11 = vld [vmem:[#allocation19_spill] sm:$0xff]  ;;  %v3754_v33 = vmov 0.0  }
 0x31d   :  { %1021 = vmatprep.subr.mxu0 %v2253_v13  ;;  %1092 = vmatprep.subr.mxu1 %v2378_v35  ;;  %v3739_v13 = vld [vmem:[#allocation10_spill] sm:$0xff] }
 0x31e   :  { %1022 = vmatpush1.msra.mxu0 %v2263_v15  ;;  %1093 = vmatpush1.msra.mxu1 %v2390_v37  ;;  %v3740_v15 = vld [vmem:[#allocation20_spill] sm:$0xff]  ;;  %v2935_v35 = vld [vmem:[%s3560_s2 + $0x1e8] sm:$0xff] }
 0x31f   :  { %1023 = vmatprep.subr.mxu0 %v2274_v17  ;;  %1094 = vmatprep.subr.mxu1 %v2402_v39  ;;  %v3741_v17 = vld [vmem:[#allocation11_spill] sm:$0xff]  ;;  %3756 = vst [vmem:[#allocation6_spill] sm:$0xff] %v2935_v35 }
 0x320   :  { %1024 = vmatpush1.msra.mxu0 %v2283_v19  ;;  %1095 = vmatpush1.msra.mxu1 %v2414_v41  ;;  %v3742_v19 = vld [vmem:[#allocation21_spill] sm:$0xff] }
 0x321   :  { %1025 = vmatprep.subr.mxu0 %v2294_v21  ;;  %1096 = vmatprep.subr.mxu1 %v2426_v43  ;;  %v3743_v21 = vld [vmem:[#allocation12_spill] sm:$0xff] }
 0x322   :  { %1026 = vmatpush1.msra.mxu0 %v2300_v22  ;;  %1097 = vmatpush1.msra.mxu1 %v2438_v45  ;;  %v3744_v22 = vld [vmem:[#allocation22_spill] sm:$0xff] }
 0x323   :  { %1027 = vmatprep.subr.mxu0 %v2311_v24  ;;  %1098 = vmatprep.subr.mxu1 %v2450_v47  ;;  %v3745_v24 = vld [vmem:[#allocation13_spill] sm:$0xff] }
 0x324   :  { %1028 = vmatpush1.msra.mxu0 %v2323_v26  ;;  %1099 = vmatpush1.msra.mxu1 %v2462_v49  ;;  %v3747_v26 = vld [vmem:[#allocation14_spill] sm:$0xff] }
 0x325   :  { %1029 = vmatprep.subr.mxu0 %v2335_v28  ;;  %1100 = vmatprep.subr.mxu1 %v2474_v51  ;;  %v3749_v28 = vld [vmem:[#allocation15_spill] sm:$0xff] }
 0x326   :  { %1030 = vmatpush1.msra.mxu0 %v2347_v30  ;;  %1101 = vmatpush1.msra.mxu1 %v2486_v53  ;;  %v3751_v30 = vld [vmem:[#allocation16_spill] sm:$0xff] }
 0x327   :  { %1031 = vmatprep.subr.mxu0 %v2359_v32  ;;  %1102 = vmatprep.subr.mxu1 %v2498_v55  ;;  %v3753_v32 = vld [vmem:[#allocation17_spill] sm:$0xff] }
 0x328   :  { %1032 = vmatpush1.msra.mxu0 %v2371_v34  ;;  %1103 = vmatpush1.msra.mxu1 %v2510_v57  ;;  %v3755_v34 = vld [vmem:[#allocation27_spill] sm:$0xff] }
 0x329   :  { %1033 = vmatprep.subr.mxu0 %v2383_v36  ;;  %1104 = vmatprep.subr.mxu1 %v2522_v59  ;;  %v2941_v36 = vld [vmem:[%s3560_s2 + $0x1f8] sm:$0xff] }
 0x32a   :  { %1034 = vmatpush1.msra.mxu0 %v2395_v38  ;;  %1105 = vmatpush1.msra.mxu1 %v2534_v61  ;;  %3757 = vst [vmem:[#allocation5_spill] sm:$0xff] %v2941_v36 }
 0x32b   :  { %1035 = vmatprep.subr.mxu0 %v2407_v40  ;;  %1106 = vmatprep.subr.mxu1 %v2546_v63 }
 0x32c   :  { %1036 = vmatpush1.msra.mxu0 %v2419_v42  ;;  %1107 = vmatpush1.msra.mxu1 %v2553_v0 }
 0x32d   :  { %1037 = vmatprep.subr.mxu0 %v3735_v3  ;;  %1108 = vmatprep.subr.mxu1 %v3736_v7  ;;  %v3009_v3 = vld [vmem:[%s3560_s2 + $0x1b0] sm:$0xff]  ;;  %v3015_v7 = vld [vmem:[%s3560_s2 + $0x188] sm:$0xff] }
 0x32e   :  { %1038 = vmatpush1.msra.mxu0 %v3737_v9  ;;  %1109 = vmatpush1.msra.mxu1 %v3738_v11  ;;  %v3021_v9 = vld [vmem:[%s3560_s2 + $0x198] sm:$0xff]  ;;  %v3027_v11 = vld [vmem:[%s3560_s2 + $0x180] sm:$0xff] }
 0x32f   :  { %1039 = vmatprep.subr.mxu0 %v3739_v13  ;;  %1110 = vmatprep.subr.mxu1 %v3740_v15  ;;  %v3033_v13 = vld [vmem:[%s3560_s2 + $0x190] sm:$0xff]  ;;  %v3039_v15 = vld [vmem:[%s3560_s2 + $0x168] sm:$0xff] }
 0x330   :  { %1040 = vmatpush1.msra.mxu0 %v3741_v17  ;;  %1111 = vmatpush1.msra.mxu1 %v3742_v19  ;;  %v3045_v17 = vld [vmem:[%s3560_s2 + $0x178] sm:$0xff]  ;;  %v3051_v19 = vld [vmem:[%s3560_s2 + $0x160] sm:$0xff] }
 0x331   :  { %1041 = vmatprep.subr.mxu0 %v3743_v21  ;;  %1112 = vmatprep.subr.mxu1 %v3744_v22  ;;  %v3057_v21 = vld [vmem:[%s3560_s2 + $0x170] sm:$0xff]  ;;  %v3063_v22 = vld [vmem:[%s3560_s2 + $0x148] sm:$0xff] }
 0x332   :  { %1042 = vmatpush1.msra.mxu0 %v3745_v24  ;;  %1113 = vmatpush1.msra.mxu1 %v3746_v25  ;;  %v3069_v24 = vld [vmem:[%s3560_s2 + $0x158] sm:$0xff]  ;;  %v3075_v25 = vld [vmem:[%s3560_s2 + $0x140] sm:$0xff] }
 0x333   :  { %1043 = vmatprep.subr.mxu0 %v3747_v26  ;;  %1114 = vmatprep.subr.mxu1 %v3748_v27  ;;  %v3081_v26 = vld [vmem:[%s3560_s2 + $0x150] sm:$0xff]  ;;  %v3087_v27 = vld [vmem:[%s3560_s2 + $0x128] sm:$0xff] }
 0x334   :  { %1044 = vmatpush1.msra.mxu0 %v3749_v28  ;;  %1115 = vmatpush1.msra.mxu1 %v3750_v29  ;;  %v3093_v28 = vld [vmem:[%s3560_s2 + $0x138] sm:$0xff]  ;;  %v3099_v29 = vld [vmem:[%s3560_s2 + $0x120] sm:$0xff] }
 0x335   :  { %1045 = vmatprep.subr.mxu0 %v3751_v30  ;;  %1116 = vmatprep.subr.mxu1 %v3752_v31  ;;  %v3105_v30 = vld [vmem:[%s3560_s2 + $0x130] sm:$0xff]  ;;  %v3111_v31 = vld [vmem:[%s3560_s2 + $0x108] sm:$0xff] }
 0x336   :  { %1046 = vmatpush1.msra.mxu0 %v3753_v32  ;;  %1079 = vmatprep.mubr.f32.mxu0 %v3754_v33  ;;  %v3117_v32 = vld [vmem:[%s3560_s2 + $0x118] sm:$0xff] }
 0x337   :  { %1117 = vmatpush1.msra.mxu1 %v3755_v34  ;;  %1150 = vmatprep.mubr.f32.mxu1 %v3754_v33  ;;  %v3123_v34 = vld [vmem:[%s3560_s2 + $0x100] sm:$0xff] }
 0x338   :  { %1188 = vmatprep.subr.mxu0 %v2935_v35  ;;  %1259 = vmatprep.subr.mxu1 %v2941_v36 }
 0x3d7   :  { %v893_v37 = vpop.f32.mrf.mxu0  ;;  %v964_v41 = vpop.f32.mrf.mxu1 }
 0x3d8   :  { %v973_v38 = vrot.slane %v893_v37, 2  ;;  %v975_v55 = vrot.slane %v964_v41, 2  ;;  %v3129_v37 = vld [vmem:[%s3560_s2 + $0x110] sm:$0xff] }
 0x3d9   :  { %v895_v39 = vpop.f32.mrf.mxu0  ;;  %v966_v49 = vpop.f32.mrf.mxu1  ;;  %v3153_v41 = vld [vmem:[%s3560_s2 + $0xf0] sm:$0xff] }
 0x3da   :  { %v981_v40 = vadd.f32 %v973_v38, %v2701_v8  ;;  %v974_v42 = vrot.slane %v895_v39, 2  ;;  %v976_v51 = vrot.slane %v966_v49, 2  ;;  %v983_v61 = vadd.f32 %v975_v55, %v2714_v50  ;;  %v3135_v38 = vld [vmem:[%s3560_s2 + $0xe8] sm:$0xff]  ;;  %v3141_v39 = vld [vmem:[%s3560_s2 + $0xf8] sm:$0xff]  ;;  %v3201_v55 = vld [vmem:[%s3560_s2 + $0xb0] sm:$0xff] }
 0x3db   :  { %v3183_v49 = vld [vmem:[%s3560_s2 + $0xa8] sm:$0xff] }
 0x3dc   :  { %v1873_v43 = vmul.f32 -1.442695, %v981_v40  ;;  %v982_v45 = vadd.f32 %v974_v42, %v2703_v6  ;;  %v984_v53 = vadd.f32 %v976_v51, %v2711_v12  ;;  %v3147_v40 = vld [vmem:[%s3560_s2 + $0xe0] sm:$0xff]  ;;  %v3159_v42 = vld [vmem:[%s3560_s2 + $0xc8] sm:$0xff]  ;;  %v3189_v51 = vld [vmem:[%s3560_s2 + $0xb8] sm:$0xff] }
 0x3de   :  { %1992 = vpow2.f32 %v1873_v43  ;;  %v1874_v47 = vmul.f32 -1.442695, %v982_v45  ;;  %v1875_v57 = vmul.f32 -1.442695, %v984_v53  ;;  %v3165_v43 = vld [vmem:[%s3560_s2 + $0xd8] sm:$0xff]  ;;  %v3171_v45 = vld [vmem:[%s3560_s2 + $0xc0] sm:$0xff] }
 0x3df   :  { %v3195_v53 = vld [vmem:[%s3560_s2 + $0xa0] sm:$0xff] }
 0x3e0   :  { %1994 = vpow2.f32 %v1874_v47  ;;  %v3177_v47 = vld [vmem:[%s3560_s2 + $0xd0] sm:$0xff] }
 0x3e1   :  { %1996 = vpow2.f32 %v1875_v57  ;;  %v3207_v57 = vld [vmem:[%s3560_s2 + $0x88] sm:$0xff] }
 0x3e2   :  { %3758 = vst [vmem:[#allocation7_spill] sm:$0xff] %v3207_v57 }
 0x3eb   :  { %v1993_v59 = vpop.eup %1992 }
 0x3ec   :  { %v988_v63 = vadd.f32 1.0, %v1993_v59  ;;  %v3213_v59 = vld [vmem:[%s3560_s2 + $0x98] sm:$0xff] }
 0x3ed   :  { %v1995_v0 = vpop.eup %1994  ;;  %3759 = vst [vmem:[#allocation8_spill] sm:$0xff] %v3213_v59 }
 0x3ee   :  { %1998 = vrcp.f32 %v988_v63  ;;  %v994_v8 = vadd.f32 1.0, %v1995_v0  ;;  %v1997_v6 = vpop.eup %1996  ;;  %v3225_v63 = vld [vmem:[%s3560_s2 + $0x90] sm:$0xff]  ;;  %v3231_v0 = vld [vmem:[%s3560_s2 + $0x68] sm:$0xff] }
 0x3ef   :  { %2000 = vtanh.f32 %v983_v61  ;;  %v1001_v5 = vadd.f32 1.0, %v1997_v6  ;;  %v3219_v61 = vld [vmem:[%s3560_s2 + $0x80] sm:$0xff]  ;;  %3761 = vst [vmem:[#allocation9_spill] sm:$0xff] %v3225_v63  ;;  %3762 = vst [vmem:[#allocation19_spill] sm:$0xff] %v3231_v0 }
 0x3f0   :  { %2002 = vrcp.f32 %v994_v8  ;;  %3760 = vst [vmem:[#allocation18_spill] sm:$0xff] %v3219_v61  ;;  %v3237_v8 = vld [vmem:[%s3560_s2 + $0x78] sm:$0xff]  ;;  %v3243_v6 = vld [vmem:[%s3560_s2 + $0x60] sm:$0xff] }
 0x3f1   :  { %2004 = vrcp.f32 %v1001_v5  ;;  %3763 = vst [vmem:[#allocation10_spill] sm:$0xff] %v3237_v8  ;;  %3764 = vst [vmem:[#allocation20_spill] sm:$0xff] %v3243_v6  ;;  %v3273_v5 = vld [vmem:[%s3560_s2 + $0x50] sm:$0xff] }
 0x3f2   :  { %3769 = vst [vmem:[#allocation13_spill] sm:$0xff] %v3273_v5 }
 0x3fb   :  { %v1999_v4 = vpop.eup %1998 }
 0x3fc   :  { %v2001_v1 = vpop.eup %2000 }
 0x3fd   :  { %v2003_v54 = vpop.eup %2002  ;;  %v1008_v12 = vmul.f32 %v2001_v1, %v1999_v4  ;;  %v3249_v4 = vld [vmem:[%s3560_s2 + $0x70] sm:$0xff]  ;;  %v3255_v1 = vld [vmem:[%s3560_s2 + $0x48] sm:$0xff] }
 0x3fe   :  { %v1007_v60 = vmul.f32 %v2003_v54, %v1005_v48  ;;  %v2005_v50 = vpop.eup %2004  ;;  %3765 = vst [vmem:[#allocation11_spill] sm:$0xff] %v3249_v4  ;;  %3766 = vst [vmem:[#allocation21_spill] sm:$0xff] %v3255_v1  ;;  %v3261_v48 = vld [vmem:[%s3560_s2 + $0x58] sm:$0xff]  ;;  %v3267_v54 = vld [vmem:[%s3560_s2 + $0x40] sm:$0xff] }
 0x3ff   :  { %3767 = vst [vmem:[#allocation12_spill] sm:$0xff] %v3261_v48  ;;  %3768 = vst [vmem:[#allocation22_spill] sm:$0xff] %v3267_v54 }
 0x400   :  { %v2949_v14 = vadd.f32 %v1008_v12, %v1007_v60  ;;  %v3279_v12 = vld [vmem:[%s3560_s2 + $0x28] sm:$0xff]  ;;  %v3285_v60 = vld [vmem:[%s3560_s2 + $0x38] sm:$0xff] }
 0x401   :  { %3770 = vst [vmem:[#allocation23_spill] sm:$0xff] %v3279_v12  ;;  %3771 = vst [vmem:[#allocation14_spill] sm:$0xff] %v3285_v60 }
 0x402   :  { %2006 = vtanh.f32 %v2949_v14 }
 0x40f   :  { %v2007_v2 = vpop.eup %2006 }
 0x410   :  { %v1011_v52 = vmul.f32 %v2007_v2, %v2005_v50  ;;  %v3291_v50 = vld [vmem:[%s3560_s2 + $0x20] sm:$0xff]  ;;  %v3297_v2 = vld [vmem:[%s3560_s2 + $0x30] sm:$0xff] }
 0x411   :  { %3772 = vst [vmem:[#allocation24_spill] sm:$0xff] %v3291_v50  ;;  %3773 = vst [vmem:[#allocation15_spill] sm:$0xff] %v3297_v2 }
 0x412   :  { %v1013_v20 = vrot.slane %v1011_v52, 6  ;;  %v3303_v52 = vld [vmem:[%s3560_s2 + $0x8] sm:$0xff] }
 0x413   :  { %3774 = vst [vmem:[#allocation25_spill] sm:$0xff] %v3303_v52 }
 0x414   :  { %1080 = vmatmul.mubr.f32.vlgmr.msra.gmra.mxu0 %v1013_v20  ;;  %1151 = vmatmul.mubr.f32.vlgmr.msra.gmra.mxu1 %v1013_v20  ;;  %v3309_v20 = vld [vmem:[%s3560_s2 + $0x18] sm:$0xff] }
 0x415   :  { %1189 = vmatpush1.msra.mxu0 %v2955_v46  ;;  %1260 = vmatpush1.msra.mxu1 %v2961_v58  ;;  %3775 = vst [vmem:[#allocation16_spill] sm:$0xff] %v3309_v20 }
 0x416   :  { %1190 = vmatprep.subr.mxu0 %v2967_v56  ;;  %1261 = vmatprep.subr.mxu1 %v2973_v16 }
 0x417   :  { %1191 = vmatpush1.msra.mxu0 %v2979_v62  ;;  %1262 = vmatpush1.msra.mxu1 %v2985_v44 }
 0x418   :  { %1192 = vmatprep.subr.mxu0 %v2991_v23  ;;  %1263 = vmatprep.subr.mxu1 %v2997_v18 }
 0x419   :  { %1193 = vmatpush1.msra.mxu0 %v3003_v10  ;;  %1264 = vmatpush1.msra.mxu1 %v3009_v3 }
 0x41a   :  { %1194 = vmatprep.subr.mxu0 %v3015_v7  ;;  %1265 = vmatprep.subr.mxu1 %v3021_v9 }
 0x41b   :  { %1195 = vmatpush1.msra.mxu0 %v3027_v11  ;;  %1266 = vmatpush1.msra.mxu1 %v3033_v13 }
 0x41c   :  { %1196 = vmatprep.subr.mxu0 %v3039_v15  ;;  %1267 = vmatprep.subr.mxu1 %v3045_v17 }
 0x41d   :  { %1197 = vmatpush1.msra.mxu0 %v3051_v19  ;;  %1268 = vmatpush1.msra.mxu1 %v3057_v21 }
 0x41e   :  { %1198 = vmatprep.subr.mxu0 %v3063_v22  ;;  %1269 = vmatprep.subr.mxu1 %v3069_v24 }
 0x41f   :  { %1199 = vmatpush1.msra.mxu0 %v3075_v25  ;;  %1270 = vmatpush1.msra.mxu1 %v3081_v26 }
 0x420   :  { %1200 = vmatprep.subr.mxu0 %v3087_v27  ;;  %1271 = vmatprep.subr.mxu1 %v3093_v28 }
 0x421   :  { %1201 = vmatpush1.msra.mxu0 %v3099_v29  ;;  %1272 = vmatpush1.msra.mxu1 %v3105_v30 }
 0x422   :  { %1202 = vmatprep.subr.mxu0 %v3111_v31  ;;  %1273 = vmatprep.subr.mxu1 %v3117_v32 }
 0x423   :  { %1203 = vmatpush1.msra.mxu0 %v3123_v34  ;;  %1274 = vmatpush1.msra.mxu1 %v3129_v37 }
 0x424   :  { %1204 = vmatprep.subr.mxu0 %v3135_v38  ;;  %1275 = vmatprep.subr.mxu1 %v3141_v39 }
 0x425   :  { %1205 = vmatpush1.msra.mxu0 %v3147_v40  ;;  %1276 = vmatpush1.msra.mxu1 %v3153_v41 }
 0x426   :  { %1206 = vmatprep.subr.mxu0 %v3159_v42  ;;  %1277 = vmatprep.subr.mxu1 %v3165_v43 }
 0x427   :  { %1207 = vmatpush1.msra.mxu0 %v3171_v45  ;;  %1278 = vmatpush1.msra.mxu1 %v3177_v47 }
 0x428   :  { %1208 = vmatprep.subr.mxu0 %v3183_v49  ;;  %1279 = vmatprep.subr.mxu1 %v3189_v51 }
 0x429   :  { %1209 = vmatpush1.msra.mxu0 %v3195_v53  ;;  %1280 = vmatpush1.msra.mxu1 %v3201_v55 }
 0x42a   :  { %1210 = vmatprep.subr.mxu0 %v3207_v57  ;;  %1281 = vmatprep.subr.mxu1 %v3213_v59 }
 0x42b   :  { %1211 = vmatpush1.msra.mxu0 %v3219_v61  ;;  %1282 = vmatpush1.msra.mxu1 %v3225_v63 }
 0x42c   :  { %1212 = vmatprep.subr.mxu0 %v3231_v0  ;;  %1283 = vmatprep.subr.mxu1 %v3237_v8  ;;  %v3781_v0 = vld [vmem:[#allocation30_spill] sm:$0xff] }
 0x42d   :  { %1213 = vmatpush1.msra.mxu0 %v3243_v6  ;;  %1284 = vmatpush1.msra.mxu1 %v3249_v4  ;;  %v3780_v6 = vld [vmem:[#allocation31_spill] sm:$0xff] }
 0x42e   :  { %1214 = vmatprep.subr.mxu0 %v3255_v1  ;;  %1285 = vmatprep.subr.mxu1 %v3261_v48 }
 0x42f   :  { %1215 = vmatpush1.msra.mxu0 %v3267_v54  ;;  %1286 = vmatpush1.msra.mxu1 %v3273_v5  ;;  %v3779_v5 = vld [vmem:[#allocation29_spill] sm:$0xff] }
 0x430   :  { %1216 = vmatprep.subr.mxu0 %v3279_v12  ;;  %1287 = vmatprep.subr.mxu1 %v3285_v60 }
 0x431   :  { %1217 = vmatpush1.msra.mxu0 %v3291_v50  ;;  %1288 = vmatpush1.msra.mxu1 %v3297_v2  ;;  %v3315_v50 = vld [vmem:[%s3560_s2] sm:$0xff] }
 0x432   :  { %1218 = vmatprep.subr.mxu0 %v3303_v52  ;;  %1289 = vmatprep.subr.mxu1 %v3309_v20  ;;  %3776 = vst [vmem:[#allocation26_spill] sm:$0xff] %v3315_v50  ;;  %v3322_v52 = vld [vmem:[%s3560_s2 + $0x10] sm:$0xff]  ;;  %v3778_v2 = vld [vmem:[#allocation28_spill] sm:$0xff] }
 0x433   :  { %1219 = vmatpush1.msra.mxu0 %v3315_v50  ;;  %1252 = vmatprep.mubr.f32.mxu0 %v3754_v33  ;;  %3777 = vst [vmem:[#allocation17_spill] sm:$0xff] %v3322_v52 }
 0x434   :  { %1290 = vmatpush1.msra.mxu1 %v3322_v52  ;;  %1323 = vmatprep.mubr.f32.mxu1 %v3754_v33 }
 0x435   :  { %1376 = vmatprep.subr.mxu0 %v2935_v35  ;;  %1447 = vmatprep.subr.mxu1 %v2941_v36 }
 0x4d4   :  { %v1081_v20 = vpop.f32.mrf.mxu0  ;;  %v1152_v48 = vpop.f32.mrf.mxu1 }
 0x4d5   :  { %v1157_v60 = vadd.f32 %v1081_v20, %v3778_v2  ;;  %v1159_v35 = vadd.f32 %v1152_v48, %v3781_v0  ;;  %v3785_v48 = vld [vmem:[#allocation20_spill] sm:$0xff] }
 0x4d6   :  { %v1083_v12 = vpop.f32.mrf.mxu0  ;;  %v1154_v4 = vpop.f32.mrf.mxu1 }
 0x4d7   :  { %v1876_v50 = vmul.f32 -1.442695, %v1157_v60  ;;  %v1158_v54 = vadd.f32 %v1083_v12, %v3779_v5  ;;  %v1160_v52 = vadd.f32 %v1154_v4, %v3780_v6 }
 0x4d9   :  { %2008 = vpow2.f32 %v1876_v50  ;;  %v1877_v1 = vmul.f32 -1.442695, %v1158_v54  ;;  %v1878_v8 = vmul.f32 -1.442695, %v1160_v52  ;;  %v1181_v54 = vrot.slane %v2949_v14, 6  ;;  %v3784_v14 = vld [vmem:[#allocation10_spill] sm:$0xff] }
 0x4db   :  { %2010 = vpow2.f32 %v1877_v1 }
 0x4dc   :  { %2012 = vpow2.f32 %v1878_v8 }
 0x4e6   :  { %v2009_v33 = vpop.eup %2008 }
 0x4e7   :  { %v1164_v63 = vadd.f32 1.0, %v2009_v33 }
 0x4e8   :  { %v2011_v36 = vpop.eup %2010 }
 0x4e9   :  { %2014 = vrcp.f32 %v1164_v63  ;;  %v1170_v20 = vadd.f32 1.0, %v2011_v36  ;;  %v2013_v60 = vpop.eup %2012  ;;  %v3783_v36 = vld [vmem:[#allocation19_spill] sm:$0xff] }
 0x4ea   :  { %2016 = vtanh.f32 %v1159_v35  ;;  %v1177_v5 = vadd.f32 1.0, %v2013_v60  ;;  %v3782_v35 = vld [vmem:[#allocation9_spill] sm:$0xff]  ;;  %v3789_v60 = vld [vmem:[#allocation22_spill] sm:$0xff] }
 0x4eb   :  { %2018 = vrcp.f32 %v1170_v20  ;;  %v3788_v20 = vld [vmem:[#allocation12_spill] sm:$0xff] }
 0x4ec   :  { %2020 = vrcp.f32 %v1177_v5  ;;  %v3786_v5 = vld [vmem:[#allocation11_spill] sm:$0xff] }
 0x4f6   :  { %v2015_v12 = vpop.eup %2014 }
 0x4f7   :  { %v2017_v50 = vpop.eup %2016 }
 0x4f8   :  { %v2019_v1 = vpop.eup %2018  ;;  %v1184_v2 = vmul.f32 %v2017_v50, %v2015_v12  ;;  %v3790_v12 = vld [vmem:[#allocation13_spill] sm:$0xff]  ;;  %v3791_v50 = vld [vmem:[#allocation23_spill] sm:$0xff] }
 0x4f9   :  { %v1183_v4 = vmul.f32 %v2019_v1, %v1181_v54  ;;  %v2021_v33 = vpop.eup %2020  ;;  %v3792_v54 = vld [vmem:[#allocation14_spill] sm:$0xff]  ;;  %v3793_v1 = vld [vmem:[#allocation24_spill] sm:$0xff] }
 0x4fb   :  { %v3333_v52 = vadd.f32 %v1184_v2, %v1183_v4  ;;  %v3787_v2 = vld [vmem:[#allocation21_spill] sm:$0xff]  ;;  %v3794_v4 = vld [vmem:[#allocation15_spill] sm:$0xff] }
 0x4fd   :  { %2022 = vtanh.f32 %v3333_v52 }
 0x50a   :  { %v2023_v8 = vpop.eup %2022 }
 0x50b   :  { %v1187_v63 = vmul.f32 %v2023_v8, %v2021_v33  ;;  %v3795_v33 = vld [vmem:[#allocation25_spill] sm:$0xff]  ;;  %v3796_v8 = vld [vmem:[#allocation16_spill] sm:$0xff] }
 0x50d   :  { %1253 = vmatmul.mubr.f32.vlgmr.msra.gmra.mxu0 %v1187_v63  ;;  %1324 = vmatmul.mubr.f32.vlgmr.msra.gmra.mxu1 %v1187_v63  ;;  %v3797_v63 = vld [vmem:[#allocation26_spill] sm:$0xff] }
 0x50e   :  { %1377 = vmatpush1.msra.mxu0 %v2955_v46  ;;  %1448 = vmatpush1.msra.mxu1 %v2961_v58 }
 0x50f   :  { %1378 = vmatprep.subr.mxu0 %v2967_v56  ;;  %1449 = vmatprep.subr.mxu1 %v2973_v16 }
 0x510   :  { %1379 = vmatpush1.msra.mxu0 %v2979_v62  ;;  %1450 = vmatpush1.msra.mxu1 %v2985_v44 }
 0x511   :  { %1380 = vmatprep.subr.mxu0 %v2991_v23  ;;  %1451 = vmatprep.subr.mxu1 %v2997_v18 }
 0x512   :  { %1381 = vmatpush1.msra.mxu0 %v3003_v10  ;;  %1452 = vmatpush1.msra.mxu1 %v3009_v3 }
 0x513   :  { %1382 = vmatprep.subr.mxu0 %v3015_v7  ;;  %1453 = vmatprep.subr.mxu1 %v3021_v9 }
 0x514   :  { %1383 = vmatpush1.msra.mxu0 %v3027_v11  ;;  %1454 = vmatpush1.msra.mxu1 %v3033_v13 }
 0x515   :  { %1384 = vmatprep.subr.mxu0 %v3039_v15  ;;  %1455 = vmatprep.subr.mxu1 %v3045_v17 }
 0x516   :  { %1385 = vmatpush1.msra.mxu0 %v3051_v19  ;;  %1456 = vmatpush1.msra.mxu1 %v3057_v21 }
 0x517   :  { %1386 = vmatprep.subr.mxu0 %v3063_v22  ;;  %1457 = vmatprep.subr.mxu1 %v3069_v24 }
 0x518   :  { %1387 = vmatpush1.msra.mxu0 %v3075_v25  ;;  %1458 = vmatpush1.msra.mxu1 %v3081_v26 }
 0x519   :  { %1388 = vmatprep.subr.mxu0 %v3087_v27  ;;  %1459 = vmatprep.subr.mxu1 %v3093_v28 }
 0x51a   :  { %1389 = vmatpush1.msra.mxu0 %v3099_v29  ;;  %1460 = vmatpush1.msra.mxu1 %v3105_v30 }
 0x51b   :  { %1390 = vmatprep.subr.mxu0 %v3111_v31  ;;  %1461 = vmatprep.subr.mxu1 %v3117_v32 }
 0x51c   :  { %1391 = vmatpush1.msra.mxu0 %v3123_v34  ;;  %1462 = vmatpush1.msra.mxu1 %v3129_v37 }
 0x51d   :  { %1392 = vmatprep.subr.mxu0 %v3135_v38  ;;  %1463 = vmatprep.subr.mxu1 %v3141_v39 }
 0x51e   :  { %1393 = vmatpush1.msra.mxu0 %v3147_v40  ;;  %1464 = vmatpush1.msra.mxu1 %v3153_v41 }
 0x51f   :  { %1394 = vmatprep.subr.mxu0 %v3159_v42  ;;  %1465 = vmatprep.subr.mxu1 %v3165_v43 }
 0x520   :  { %1395 = vmatpush1.msra.mxu0 %v3171_v45  ;;  %1466 = vmatpush1.msra.mxu1 %v3177_v47 }
 0x521   :  { %1396 = vmatprep.subr.mxu0 %v3183_v49  ;;  %1467 = vmatprep.subr.mxu1 %v3189_v51 }
 0x522   :  { %1397 = vmatpush1.msra.mxu0 %v3195_v53  ;;  %1468 = vmatpush1.msra.mxu1 %v3201_v55 }
 0x523   :  { %1398 = vmatprep.subr.mxu0 %v3207_v57  ;;  %1469 = vmatprep.subr.mxu1 %v3213_v59 }
 0x524   :  { %1399 = vmatpush1.msra.mxu0 %v3219_v61  ;;  %1470 = vmatpush1.msra.mxu1 %v3782_v35 }
 0x525   :  { %1400 = vmatprep.subr.mxu0 %v3783_v36  ;;  %1471 = vmatprep.subr.mxu1 %v3784_v14  ;;  %v3803_v14 = vld [vmem:[#allocation29_spill] sm:$0xff] }
 0x526   :  { %1401 = vmatpush1.msra.mxu0 %v3785_v48  ;;  %1472 = vmatpush1.msra.mxu1 %v3786_v5 }
 0x527   :  { %1402 = vmatprep.subr.mxu0 %v3787_v2  ;;  %1473 = vmatprep.subr.mxu1 %v3788_v20  ;;  %v3798_v2 = vmov 0.0   ;;  %v3799_v20 = vld [vmem:[#allocation17_spill] sm:$0xff] }
 0x528   :  { %1403 = vmatpush1.msra.mxu0 %v3789_v60  ;;  %1474 = vmatpush1.msra.mxu1 %v3790_v12  ;;  %v3800_v12 = vld [vmem:[#allocation6_spill] sm:$0xff] }
 0x529   :  { %1404 = vmatprep.subr.mxu0 %v3791_v50  ;;  %1475 = vmatprep.subr.mxu1 %v3792_v54  ;;  %v3801_v50 = vld [vmem:[#allocation5_spill] sm:$0xff] }
 0x52a   :  { %1405 = vmatpush1.msra.mxu0 %v3793_v1  ;;  %1476 = vmatpush1.msra.mxu1 %v3794_v4  ;;  %v3802_v4 = vld [vmem:[#allocation28_spill] sm:$0xff] }
 0x52b   :  { %1406 = vmatprep.subr.mxu0 %v3795_v33  ;;  %1477 = vmatprep.subr.mxu1 %v3796_v8 }
 0x52c   :  { %1407 = vmatpush1.msra.mxu0 %v3797_v63  ;;  %1440 = vmatprep.mubr.f32.mxu0 %v3798_v2 }
 0x52d   :  { %1478 = vmatpush1.msra.mxu1 %v3799_v20  ;;  %1511 = vmatprep.mubr.f32.mxu1 %v3798_v2 }
 0x52e   :  { %1564 = vmatprep.subr.mxu0 %v3800_v12  ;;  %1635 = vmatprep.subr.mxu1 %v3801_v50 }
 0x5cd   :  { %v1254_v54 = vpop.f32.mrf.mxu0  ;;  %v1325_v33 = vpop.f32.mrf.mxu1 }
 0x5ce   :  { %v1334_v1 = vrot.slane %v1254_v54, 6  ;;  %v1336_v12 = vrot.slane %v1325_v33, 6 }
 0x5cf   :  { %v1256_v60 = vpop.f32.mrf.mxu0  ;;  %v1327_v35 = vpop.f32.mrf.mxu1 }
 0x5d0   :  { %v1342_v5 = vadd.f32 %v1334_v1, %v3802_v4  ;;  %v1335_v48 = vrot.slane %v1256_v60, 6  ;;  %v1337_v20 = vrot.slane %v1327_v35, 6  ;;  %v1344_v54 = vadd.f32 %v1336_v12, %v3781_v0 }
 0x5d2   :  { %v1879_v8 = vmul.f32 -1.442695, %v1342_v5  ;;  %v1343_v63 = vadd.f32 %v1335_v48, %v3803_v14  ;;  %v1345_v2 = vadd.f32 %v1337_v20, %v3780_v6 }
 0x5d4   :  { %2024 = vpow2.f32 %v1879_v8  ;;  %v1880_v36 = vmul.f32 -1.442695, %v1343_v63  ;;  %v1881_v61 = vmul.f32 -1.442695, %v1345_v2 }
 0x5d6   :  { %2026 = vpow2.f32 %v1880_v36  ;;  %v1366_v36 = vrot.slane %v3333_v52, 6 }
 0x5d7   :  { %2028 = vpow2.f32 %v1881_v61 }
 0x5e1   :  { %v2025_v50 = vpop.eup %2024 }
 0x5e2   :  { %v1349_v59 = vadd.f32 1.0, %v2025_v50 }
 0x5e3   :  { %v2027_v57 = vpop.eup %2026 }
 0x5e4   :  { %2030 = vrcp.f32 %v1349_v59  ;;  %v1355_v60 = vadd.f32 1.0, %v2027_v57  ;;  %v2029_v48 = vpop.eup %2028 }
 0x5e5   :  { %2032 = vtanh.f32 %v1344_v54  ;;  %v1362_v8 = vadd.f32 1.0, %v2029_v48 }
 0x5e6   :  { %2034 = vrcp.f32 %v1355_v60 }
 0x5e7   :  { %2036 = vrcp.f32 %v1362_v8 }
 0x5f1   :  { %v2031_v5 = vpop.eup %2030 }
 0x5f2   :  { %v2033_v1 = vpop.eup %2032 }
 0x5f3   :  { %v2035_v35 = vpop.eup %2034  ;;  %v1369_v20 = vmul.f32 %v2033_v1, %v2031_v5 }
 0x5f4   :  { %v1368_v33 = vmul.f32 %v2035_v35, %v1366_v36  ;;  %v2037_v63 = vpop.eup %2036 }
 0x5f6   :  { %v3407_v2 = vadd.f32 %v1369_v20, %v1368_v33  ;;  %v1764_v20 = vld [vmem:[%s3562_s4 + $0x78] sm:$0xff]  ;;  %v1763_v33 = vld [vmem:[%s3562_s4 + $0x70] sm:$0xff] }
 0x5f8   :  { %2038 = vtanh.f32 %v3407_v2  ;;  %v1554_v12 = vrot.slane %v3407_v2, 6  ;;  %v1762_v2 = vld [vmem:[%s3562_s4 + $0x68] sm:$0xff] }
 0x605   :  { %v2039_v61 = vpop.eup %2038 }
 0x606   :  { %v1372_v59 = vmul.f32 %v2039_v61, %v2037_v63  ;;  %v1761_v63 = vld [vmem:[%s3562_s4 + $0x60] sm:$0xff]  ;;  %v1760_v61 = vld [vmem:[%s3562_s4 + $0x58] sm:$0xff] }
 0x608   :  { %v1374_v57 = vrot.slane %v1372_v59, 2  ;;  %v1759_v59 = vld [vmem:[%s3562_s4 + $0x50] sm:$0xff] }
 0x60a   :  { %1441 = vmatmul.mubr.f32.vlgmr.msra.gmra.mxu0 %v1374_v57  ;;  %1512 = vmatmul.mubr.f32.vlgmr.msra.gmra.mxu1 %v1374_v57  ;;  %v1758_v57 = vld [vmem:[%s3562_s4 + $0x48] sm:$0xff] }
 0x60b   :  { %1565 = vmatpush1.msra.mxu0 %v2955_v46  ;;  %1636 = vmatpush1.msra.mxu1 %v2961_v58  ;;  %v3804_v46 = vld [vmem:[#allocation7_spill] sm:$0xff]  ;;  %v3805_v58 = vld [vmem:[#allocation8_spill] sm:$0xff] }
 0x60c   :  { %1566 = vmatprep.subr.mxu0 %v2967_v56  ;;  %1637 = vmatprep.subr.mxu1 %v2973_v16  ;;  %v3806_v56 = vld [vmem:[#allocation18_spill] sm:$0xff]  ;;  %v3807_v16 = vld [vmem:[#allocation9_spill] sm:$0xff] }
 0x60d   :  { %1567 = vmatpush1.msra.mxu0 %v2979_v62  ;;  %1638 = vmatpush1.msra.mxu1 %v2985_v44  ;;  %v3808_v62 = vld [vmem:[#allocation19_spill] sm:$0xff]  ;;  %v3809_v44 = vld [vmem:[#allocation10_spill] sm:$0xff] }
 0x60e   :  { %1568 = vmatprep.subr.mxu0 %v2991_v23  ;;  %1639 = vmatprep.subr.mxu1 %v2997_v18  ;;  %v3810_v23 = vld [vmem:[#allocation20_spill] sm:$0xff]  ;;  %v3811_v18 = vld [vmem:[#allocation11_spill] sm:$0xff] }
 0x60f   :  { %1569 = vmatpush1.msra.mxu0 %v3003_v10  ;;  %1640 = vmatpush1.msra.mxu1 %v3009_v3  ;;  %v3812_v10 = vld [vmem:[#allocation21_spill] sm:$0xff]  ;;  %v3813_v3 = vld [vmem:[#allocation12_spill] sm:$0xff] }
 0x610   :  { %1570 = vmatprep.subr.mxu0 %v3015_v7  ;;  %1641 = vmatprep.subr.mxu1 %v3021_v9  ;;  %v3814_v7 = vld [vmem:[#allocation22_spill] sm:$0xff]  ;;  %v3815_v9 = vld [vmem:[#allocation13_spill] sm:$0xff] }
 0x611   :  { %1571 = vmatpush1.msra.mxu0 %v3027_v11  ;;  %1642 = vmatpush1.msra.mxu1 %v3033_v13  ;;  %v3816_v11 = vld [vmem:[#allocation23_spill] sm:$0xff]  ;;  %v3817_v13 = vld [vmem:[#allocation14_spill] sm:$0xff] }
 0x612   :  { %1572 = vmatprep.subr.mxu0 %v3039_v15  ;;  %1643 = vmatprep.subr.mxu1 %v3045_v17  ;;  %v3818_v15 = vld [vmem:[#allocation24_spill] sm:$0xff]  ;;  %v3819_v17 = vld [vmem:[#allocation15_spill] sm:$0xff] }
 0x613   :  { %1573 = vmatpush1.msra.mxu0 %v3051_v19  ;;  %1644 = vmatpush1.msra.mxu1 %v3057_v21  ;;  %v3820_v19 = vld [vmem:[#allocation25_spill] sm:$0xff]  ;;  %v3821_v21 = vld [vmem:[#allocation16_spill] sm:$0xff] }
 0x614   :  { %1574 = vmatprep.subr.mxu0 %v3063_v22  ;;  %1645 = vmatprep.subr.mxu1 %v3069_v24  ;;  %v3822_v22 = vld [vmem:[#allocation26_spill] sm:$0xff]  ;;  %v3823_v24 = vmov 0.0  }
 0x615   :  { %1575 = vmatpush1.msra.mxu0 %v3075_v25  ;;  %1646 = vmatpush1.msra.mxu1 %v3081_v26  ;;  %v3824_v25 = vld [vmem:[#allocation17_spill] sm:$0xff] }
 0x616   :  { %1576 = vmatprep.subr.mxu0 %v3087_v27  ;;  %1647 = vmatprep.subr.mxu1 %v3093_v28 }
 0x617   :  { %1577 = vmatpush1.msra.mxu0 %v3099_v29  ;;  %1648 = vmatpush1.msra.mxu1 %v3105_v30 }
 0x618   :  { %1578 = vmatprep.subr.mxu0 %v3111_v31  ;;  %1649 = vmatprep.subr.mxu1 %v3117_v32 }
 0x619   :  { %1579 = vmatpush1.msra.mxu0 %v3123_v34  ;;  %1650 = vmatpush1.msra.mxu1 %v3129_v37 }
 0x61a   :  { %1580 = vmatprep.subr.mxu0 %v3135_v38  ;;  %1651 = vmatprep.subr.mxu1 %v3141_v39 }
 0x61b   :  { %1581 = vmatpush1.msra.mxu0 %v3147_v40  ;;  %1652 = vmatpush1.msra.mxu1 %v3153_v41 }
 0x61c   :  { %1582 = vmatprep.subr.mxu0 %v3159_v42  ;;  %1653 = vmatprep.subr.mxu1 %v3165_v43 }
 0x61d   :  { %1583 = vmatpush1.msra.mxu0 %v3171_v45  ;;  %1654 = vmatpush1.msra.mxu1 %v3177_v47 }
 0x61e   :  { %1584 = vmatprep.subr.mxu0 %v3183_v49  ;;  %1655 = vmatprep.subr.mxu1 %v3189_v51 }
 0x61f   :  { %1585 = vmatpush1.msra.mxu0 %v3195_v53  ;;  %1656 = vmatpush1.msra.mxu1 %v3201_v55 }
 0x620   :  { %1586 = vmatprep.subr.mxu0 %v3804_v46  ;;  %1657 = vmatprep.subr.mxu1 %v3805_v58  ;;  %v1757_v46 = vld [vmem:[%s3562_s4 + $0x40] sm:$0xff]  ;;  %v1756_v58 = vld [vmem:[%s3562_s4 + $0x38] sm:$0xff] }
 0x621   :  { %1587 = vmatpush1.msra.mxu0 %v3806_v56  ;;  %1658 = vmatpush1.msra.mxu1 %v3807_v16  ;;  %v1755_v56 = vld [vmem:[%s3562_s4 + $0x30] sm:$0xff]  ;;  %v1754_v16 = vld [vmem:[%s3562_s4 + $0x28] sm:$0xff] }
 0x622   :  { %1588 = vmatprep.subr.mxu0 %v3808_v62  ;;  %1659 = vmatprep.subr.mxu1 %v3809_v44  ;;  %v1753_v62 = vld [vmem:[%s3562_s4 + $0x20] sm:$0xff]  ;;  %v1752_v44 = vld [vmem:[%s3562_s4 + $0x18] sm:$0xff] }
 0x623   :  { %1589 = vmatpush1.msra.mxu0 %v3810_v23  ;;  %1660 = vmatpush1.msra.mxu1 %v3811_v18  ;;  %v1751_v23 = vld [vmem:[%s3562_s4 + $0x10] sm:$0xff]  ;;  %v1750_v18 = vld [vmem:[%s3562_s4 + $0x8] sm:$0xff] }
 0x624   :  { %1590 = vmatprep.subr.mxu0 %v3812_v10  ;;  %1661 = vmatprep.subr.mxu1 %v3813_v3  ;;  %v1749_v10 = vld [vmem:[%s3562_s4] sm:$0xff] }
 0x625   :  { %1591 = vmatpush1.msra.mxu0 %v3814_v7  ;;  %1662 = vmatpush1.msra.mxu1 %v3815_v9 }
 0x626   :  { %1592 = vmatprep.subr.mxu0 %v3816_v11  ;;  %1663 = vmatprep.subr.mxu1 %v3817_v13 }
 0x627   :  { %1593 = vmatpush1.msra.mxu0 %v3818_v15  ;;  %1664 = vmatpush1.msra.mxu1 %v3819_v17 }
 0x628   :  { %1594 = vmatprep.subr.mxu0 %v3820_v19  ;;  %1665 = vmatprep.subr.mxu1 %v3821_v21 }
 0x629   :  { %1595 = vmatpush1.msra.mxu0 %v3822_v22  ;;  %1628 = vmatprep.mubr.f32.mxu0 %v3823_v24 }
 0x62a   :  { %1666 = vmatpush1.msra.mxu1 %v3824_v25  ;;  %1699 = vmatprep.mubr.f32.mxu1 %v3823_v24 }
 0x62b   :  { %1906 = vmatprep.subr.mxu0 %v3823_v24 }
 0x6ca   :  { %v1442_v26 = vpop.f32.mrf.mxu0  ;;  %v1513_v30 = vpop.f32.mrf.mxu1 }
 0x6cb   :  { %v1522_v27 = vrot.slane %v1442_v26, 4  ;;  %v1524_v41 = vrot.slane %v1513_v30, 4 }
 0x6cc   :  { %v1444_v28 = vpop.f32.mrf.mxu0  ;;  %v1515_v38 = vpop.f32.mrf.mxu1 }
 0x6cd   :  { %v1530_v29 = vadd.f32 %v1522_v27, %v3802_v4  ;;  %v1523_v31 = vrot.slane %v1444_v28, 4  ;;  %v1525_v39 = vrot.slane %v1515_v38, 4  ;;  %v1532_v45 = vadd.f32 %v1524_v41, %v3781_v0 }
 0x6cf   :  { %v1882_v32 = vmul.f32 -1.442695, %v1530_v29  ;;  %v1531_v34 = vadd.f32 %v1523_v31, %v3803_v14  ;;  %v1533_v40 = vadd.f32 %v1525_v39, %v3780_v6 }
 0x6d1   :  { %2040 = vpow2.f32 %v1882_v32  ;;  %v1883_v37 = vmul.f32 -1.442695, %v1531_v34  ;;  %v1884_v42 = vmul.f32 -1.442695, %v1533_v40 }
 0x6d3   :  { %2042 = vpow2.f32 %v1883_v37 }
 0x6d4   :  { %2044 = vpow2.f32 %v1884_v42 }
 0x6de   :  { %v2041_v43 = vpop.eup %2040 }
 0x6df   :  { %v1537_v47 = vadd.f32 1.0, %v2041_v43 }
 0x6e0   :  { %v2043_v49 = vpop.eup %2042 }
 0x6e1   :  { %2046 = vrcp.f32 %v1537_v47  ;;  %v1543_v51 = vadd.f32 1.0, %v2043_v49  ;;  %v2045_v53 = vpop.eup %2044  ;;  %v1888_v47 = vld [vmem:[%s3563_s5] ss:$0 sm:$0xff] }
 0x6e2   :  { %2048 = vtanh.f32 %v1532_v45  ;;  %v1550_v54 = vadd.f32 1.0, %v2045_v53 }
 0x6e3   :  { %2050 = vrcp.f32 %v1543_v51 }
 0x6e4   :  { %2052 = vrcp.f32 %v1550_v54 }
 0x6ee   :  { %v2047_v55 = vpop.eup %2046 }
 0x6ef   :  { %v2049_v52 = vpop.eup %2048 }
 0x6f0   :  { %v2051_v50 = vpop.eup %2050  ;;  %v1557_v60 = vmul.f32 %v2049_v52, %v2047_v55 }
 0x6f1   :  { %v1556_v48 = vmul.f32 %v2051_v50, %v1554_v12  ;;  %v2053_v1 = vpop.eup %2052 }
 0x6f3   :  { %v3480_v5 = vadd.f32 %v1557_v60, %v1556_v48 }
 0x6f5   :  { %2054 = vtanh.f32 %v3480_v5  ;;  %v1742_v37 = vrot.slane %v3480_v5, 6 }
 0x702   :  { %v2055_v36 = vpop.eup %2054 }
 0x703   :  { %v1560_v35 = vmul.f32 %v2055_v36, %v2053_v1 }
 0x705   :  { %v1562_v8 = vrot.slane %v1560_v35, 4 }
 0x707   :  { %1629 = vmatmul.mubr.f32.vlgmr.msra.gmra.mxu0 %v1562_v8  ;;  %1700 = vmatmul.mubr.f32.vlgmr.msra.gmra.mxu1 %v1562_v8 }
 0x708   :  { %1907 = vmatpush3.msra.mxu0 %v1764_v20  ;;  %1938 = vmatprep.mubr.msk.f32.mxu0 %vm2159_vm1, %v3823_v24 }
 0x709   :  { %1908 = vmatprep.subr.mxu0 %v3823_v24 }
 0x70a   :  { %1909 = vmatpush3.msra.mxu0 %v1763_v33 }
 0x70b   :  { %1910 = vmatprep.subr.mxu0 %v3823_v24 }
 0x70c   :  { %1911 = vmatpush3.msra.mxu0 %v1762_v2 }
 0x70d   :  { %1912 = vmatprep.subr.mxu0 %v3823_v24 }
 0x70e   :  { %1913 = vmatpush3.msra.mxu0 %v1761_v63 }
 0x70f   :  { %1914 = vmatprep.subr.mxu0 %v3823_v24 }
 0x710   :  { %1915 = vmatpush3.msra.mxu0 %v1760_v61 }
 0x711   :  { %1916 = vmatprep.subr.mxu0 %v3823_v24 }
 0x712   :  { %1917 = vmatpush3.msra.mxu0 %v1759_v59 }
 0x713   :  { %1918 = vmatprep.subr.mxu0 %v3823_v24 }
 0x714   :  { %1919 = vmatpush3.msra.mxu0 %v1758_v57 }
 0x715   :  { %1920 = vmatprep.subr.mxu0 %v3823_v24 }
 0x716   :  { %1921 = vmatpush3.msra.mxu0 %v1757_v46 }
 0x717   :  { %1922 = vmatprep.subr.mxu0 %v3823_v24 }
 0x718   :  { %1923 = vmatpush3.msra.mxu0 %v1756_v58 }
 0x719   :  { %1924 = vmatprep.subr.mxu0 %v3823_v24 }
 0x71a   :  { %1925 = vmatpush3.msra.mxu0 %v1755_v56 }
 0x71b   :  { %1926 = vmatprep.subr.mxu0 %v3823_v24 }
 0x71c   :  { %1927 = vmatpush3.msra.mxu0 %v1754_v16 }
 0x71d   :  { %1928 = vmatprep.subr.mxu0 %v3823_v24 }
 0x71e   :  { %1929 = vmatpush3.msra.mxu0 %v1753_v62 }
 0x71f   :  { %1930 = vmatprep.subr.mxu0 %v3823_v24 }
 0x720   :  { %1931 = vmatpush3.msra.mxu0 %v1752_v44 }
 0x721   :  { %1932 = vmatprep.subr.mxu0 %v3823_v24 }
 0x722   :  { %1933 = vmatpush3.msra.mxu0 %v1751_v23 }
 0x723   :  { %1934 = vmatprep.subr.mxu0 %v3823_v24 }
 0x724   :  { %1935 = vmatpush3.msra.mxu0 %v1750_v18 }
 0x725   :  { %1936 = vmatprep.subr.mxu0 %v3823_v24 }
 0x726   :  { %1937 = vmatpush3.msra.mxu0 %v1749_v10 }
 0x7c7   :  { %v1630_v3 = vpop.f32.mrf.mxu0  ;;  %v1701_v13 = vpop.f32.mrf.mxu1 }
 0x7c8   :  { %v1710_v7 = vrot.slane %v1630_v3, 2  ;;  %v1712_v27 = vrot.slane %v1701_v13, 2 }
 0x7c9   :  { %v1632_v9 = vpop.f32.mrf.mxu0  ;;  %v1703_v22 = vpop.f32.mrf.mxu1 }
 0x7ca   :  { %v1718_v11 = vadd.f32 %v1710_v7, %v3802_v4  ;;  %v1711_v15 = vrot.slane %v1632_v9, 2  ;;  %v1713_v25 = vrot.slane %v1703_v22, 2  ;;  %v1720_v29 = vadd.f32 %v1712_v27, %v3781_v0 }
 0x7cc   :  { %v1885_v17 = vmul.f32 -1.442695, %v1718_v11  ;;  %v1719_v19 = vadd.f32 %v1711_v15, %v3803_v14  ;;  %v1721_v26 = vadd.f32 %v1713_v25, %v3780_v6 }
 0x7ce   :  { %2056 = vpow2.f32 %v1885_v17  ;;  %v1886_v21 = vmul.f32 -1.442695, %v1719_v19  ;;  %v1887_v24 = vmul.f32 -1.442695, %v1721_v26 }
 0x7d0   :  { %2058 = vpow2.f32 %v1886_v21 }
 0x7d1   :  { %2060 = vpow2.f32 %v1887_v24 }
 0x7db   :  { %v2057_v28 = vpop.eup %2056 }
 0x7dc   :  { %v1725_v30 = vadd.f32 1.0, %v2057_v28 }
 0x7dd   :  { %v2059_v31 = vpop.eup %2058 }
 0x7de   :  { %2062 = vrcp.f32 %v1725_v30  ;;  %v1731_v4 = vadd.f32 1.0, %v2059_v31  ;;  %v2061_v14 = vpop.eup %2060 }
 0x7df   :  { %2064 = vtanh.f32 %v1720_v29  ;;  %v1738_v39 = vadd.f32 1.0, %v2061_v14 }
 0x7e0   :  { %2066 = vrcp.f32 %v1731_v4 }
 0x7e1   :  { %2068 = vrcp.f32 %v1738_v39 }
 0x7eb   :  { %v2063_v32 = vpop.eup %2062 }
 0x7ec   :  { %v2065_v34 = vpop.eup %2064 }
 0x7ed   :  { %v2067_v38 = vpop.eup %2066  ;;  %v1745_v6 = vmul.f32 %v2065_v34, %v2063_v32 }
 0x7ee   :  { %v1744_v40 = vmul.f32 %v2067_v38, %v1742_v37  ;;  %v2069_v0 = vpop.eup %2068 }
 0x7f0   :  { %v1746_v41 = vadd.f32 %v1745_v6, %v1744_v40 }
 0x7f2   :  { %2070 = vtanh.f32 %v1746_v41 }
 0x7ff   :  { %v2071_v42 = vpop.eup %2070 }
 0x800   :  { %v1748_v43 = vmul.f32 %v2071_v42, %v2069_v0 }
 0x802   :  { %v1773_v45 = vrot.slane %v1748_v43, 6 }
 0x804   :  { %1939 = vmatmul.mubr.f32.vlgmr.msra.gmra.mxu0 %v1773_v45 }
 0x8c4   :  { %v1841_v49 = vpop.f32.mrf.mxu0 }
 0x8c5   :  { %v1842_v51 = vadd.f32 %v1888_v47, %v1841_v49 }
 0x8c6   :  { %v1940_v53 = vpop.f32.mrf.mxu0 }
 0x8c7   :  { %1845 = vst [vmem:[#allocation2] sm:$0x3] %v1842_v51 }
 0x8c8   :  { %2147 = shalt.err (!%p2144_p4)
}
 0x8c9   :  { %1855 = dma.vmem_to_hbm [thread:$0]  %s1853_s16, 32, %s3564_s6, [#allocation3]  }
 0x8ca   :  { %2156 = dma.done.wait [#allocation3], 32  }
 0x8cb   :  { %2157 = vsyncadd [#allocation3], 4294967264 }
 0x8cc   :  { %1859 = vsyncpa [#allocation3], 1 }

</bundles_post_ra>
